<compile_context>
chip_gen: v7x
topology: tpu7x:2x2x1
jax: 0.10.0
libtpu: 0.0.40
codegen_flags: <defaults>
</compile_context>

<pallas_src>
import numpy as np
import jax
import jax.numpy as jnp
from jax.experimental import pallas as pl
from jax.experimental.pallas import tpu as pltpu

_INF = 100000.0                       # matches torch implementation's `inf=100000.0`
_SCALE3 = float(np.sqrt(1.0 / 3.0))
_SQRT2 = float(np.sqrt(2.0))


# ----------------------------------------------------------------------------- #
# Pallas kernel: IPA attention core.  One (batch, query-tile) per grid step.
# ----------------------------------------------------------------------------- #
def ipa_attn_kernel(qf_ref, kf_ref, bias_ref, vf_ref, z_ref, mrow_ref,
                    agg_ref, p2n_ref):
    H = qf_ref.shape[1]
    f32 = jnp.float32

    # Row (query) mask compare hoisted out of the unrolled head loop (JAX does no CSE).
    row_keep = mrow_ref[0] > 0.5                  # (TQ, 1) bool
    z_t = z_ref[0]                                # (TQ, C, L) bf16, lane-dense (L last)

    agg_parts = []
    p2n_parts = []
    # Heads unrolled at trace time (H = 4..12).
    # TODO(synk): for H >= 8 consider lax.fori_loop / a head grid axis to bound live
    # ranges (check ld/st slot_util in the bundle before/after).
    for h in range(H):
        # --- fused node + spatial logits: natural (TQ,Kf)@(Kf,L) MXU matmul ----------- #
        logits = jax.lax.dot_general(
            qf_ref[0, h], kf_ref[0, h], (((1,), (0,)), ((), ())),
            preferred_element_type=f32)                       # (TQ, L)
        # pre-folded pair bias: carries the sqrt(1/3) scale AND the -INF key/col mask
        logits = logits + bias_ref[0, h].astype(f32)

        # --- softmax over keys (f32); divide on the EUP ------------------------------- #
        m = jnp.max(logits, axis=-1, keepdims=True)
        e = jnp.exp(logits - m)
        s = jnp.sum(e, axis=-1, keepdims=True)
        alpha = e * pl.reciprocal(s, approx=True)             # (TQ, L) f32
        alpha = jnp.where(row_keep, alpha, 0.0)
        alpha_lp = alpha.astype(vf_ref.dtype)                 # bf16 MXU operand

        # --- node + spatial-point aggregation: (TQ,L) x (Dp,L)^T on the MXU ----------- #
        agg_parts.append(jax.lax.dot_general(
            alpha_lp, vf_ref[0, h], (((1,), (1,)), ((), ())),
            preferred_element_type=f32))                      # (TQ, Dp)

        # --- pair->node aggregation for this head on the VPU/XLU (alpha stays f32) ---- #
        # VPU/XLU slots are otherwise idle in this HBM-bound kernel (review opt 10).
        # TODO(synk): at production L*C, compare against a batched-MXU formulation from
        # the bundle dump and chunk over L if vreg pressure shows.
        p2n_parts.append(
            jnp.sum(alpha[:, None, :] * z_t.astype(f32), axis=-1))   # (TQ, C)

    # Single lane-dense store per output (no per-head masked vst.msk partial stores).
    agg_ref[0] = jnp.concatenate(agg_parts, axis=-1)          # (TQ, H*Dp)
    p2n_ref[0] = jnp.concatenate(p2n_parts, axis=-1)          # (TQ, H*C)


# ----------------------------------------------------------------------------- #
# VMEM budgeting helpers (block shapes padded to (8, 128) tiles, double-buffered)
# ----------------------------------------------------------------------------- #
def _round_up(x, m):
    return ((x + m - 1) // m) * m


def _slab(sub, lane):
    return _round_up(max(int(sub), 1), 8) * _round_up(max(int(lane), 1), 128)


def _vmem_capacity_bytes():
    try:
        cap = int(pltpu.get_tpu_info().vmem_capacity_bytes)
        if cap > 0:
            return cap
    except Exception:
        pass
    return 64 << 20                    # conservative fallback (v7x-class per-core VMEM)


def _vmem_budgets():
    cap = _vmem_capacity_bytes()
    if cap <= (80 << 20):              # v7x-class: 64 MiB per TensorCore
        return 36 << 20, 54 << 20      # (tile budget, vmem_limit clamp)
    return 88 << 20, 112 << 20         # v5e / v6e: 128 MiB parts


def _vmem_bytes_estimate(tq, L, H, C, Kf, Dp, in_bytes=2):
    blk_in = in_bytes * (H * _slab(tq, Kf)          # qf (query tile)
                         + H * _slab(Kf, L)         # kf (key-resident, lane-dense)
                         + H * _slab(tq, L)         # pair bias (+ key mask)
                         + H * _slab(Dp, L)         # vf (key-resident, lane-dense)
                         + tq * _slab(C, L))        # z^T tile (streamed, lane-dense)
    blk_in += 4 * _slab(tq, 1)                      # row mask
    blk_out = 4 * (_slab(tq, H * Dp) + _slab(tq, H * C))
    interm = 4 * (4 * _slab(tq, L) + tq * _slab(C, L)
                  + _slab(tq, H * Dp) + _slab(tq, H * C))
    return 2 * (blk_in + blk_out) + interm


def _choose_tq(L, H, C, Kf, Dp, budget):
    cands = [t for t in (512, 256, 128, 64, 32, 16, 8) if t <= L and L % t == 0]
    if not cands:
        cands = [L]                                 # L not 8-divisible: single full tile
    for tq in cands:                                # largest tile that fits the budget
        if _vmem_bytes_estimate(tq, L, H, C, Kf, Dp) <= budget:
            return tq
    # TODO(synk): if even the smallest query tile misses the budget (huge L), add a
    # key-tile grid axis with online softmax.
    return cands[-1]


def _vmem_limit_bytes(need, clamp):
    return int(min(max(need + (8 << 20), 32 << 20), clamp))


# ----------------------------------------------------------------------------- #
# pallas_call wrapper
# ----------------------------------------------------------------------------- #
def ipa_attention_core(mask_row, qf, kf, bias, vf, z_t, *, tq=None):
    N, H, L, Kf = qf.shape             # qf: (N, H, L, Kf)
    Dp = vf.shape[2]                   # vf: (N, H, Dp, L),  Dp = Dv + 3*Pv
    C = z_t.shape[2]                   # z_t: (N, Lq, C, Lk)

    budget, clamp = _vmem_budgets()
    if tq is None:
        tq = _choose_tq(L, H, C, Kf, Dp, budget)
    assert L % tq == 0, (L, tq)

    grid = (N, L // tq)

    # TODO(synk): on v7x add pipeline_mode=pl.Buffered(1) to the key-resident kf/vf
    # specs; on 128 MiB parts consider pl.Buffered(3) on bias/z if DMA is exposed; on
    # v7x consider fp8 storage for bias/z (review opts 8, 9, 11).
    in_specs = [
        pl.BlockSpec((1, H, tq, Kf), lambda n, i: (n, 0, i, 0)),   # qf (query tile)
        pl.BlockSpec((1, H, Kf, L), lambda n, i: (n, 0, 0, 0)),    # kf (key-resident)
        pl.BlockSpec((1, H, tq, L), lambda n, i: (n, 0, i, 0)),    # bias (+ key mask)
        pl.BlockSpec((1, H, Dp, L), lambda n, i: (n, 0, 0, 0)),    # vf (key-resident)
        pl.BlockSpec((1, tq, C, L), lambda n, i: (n, i, 0, 0)),    # z^T (streamed)
        pl.BlockSpec((1, tq, 1), lambda n, i: (n, i, 0)),          # query/row mask
    ]
    out_shape = (
        jax.ShapeDtypeStruct((N, L, H * Dp), jnp.float32),         # node+point agg
        jax.ShapeDtypeStruct((N, L, H * C), jnp.float32),          # pair->node agg
    )
    out_specs = (
        pl.BlockSpec((1, tq, H * Dp), lambda n, i: (n, i, 0)),     # lane-dense
        pl.BlockSpec((1, tq, H * C), lambda n, i: (n, i, 0)),      # lane-dense
    )

    flops = int(2 * N * H * L * L * (Kf + Dp + C))
    bytes_accessed = 0
    for arr in (mask_row, qf, kf, bias, vf, z_t):
        bytes_accessed += int(arr.size) * arr.dtype.itemsize
    bytes_accessed += int(N * L * H * (Dp + C) * 4)
    cost = pl.CostEstimate(flops=flops, transcendentals=int(N * H * L * L),
                           bytes_accessed=int(bytes_accessed))

    need = _vmem_bytes_estimate(tq, L, H, C, Kf, Dp)
    return pl.pallas_call(
        ipa_attn_kernel,
        out_shape=out_shape,
        grid=grid,
        in_specs=in_specs,
        out_specs=out_specs,
        compiler_params=pltpu.CompilerParams(
            dimension_semantics=("parallel", "parallel"),
            vmem_limit_bytes=_vmem_limit_bytes(need, clamp)),
        cost_estimate=cost,
    )(qf, kf, bias, vf, z_t, mask_row)


# ----------------------------------------------------------------------------- #
# Plain-JAX glue (projections, frames, layer norms, MLPs)
# ----------------------------------------------------------------------------- #
def linear(x, W, b=None):
    y = x @ W.T
    if b is not None:
        y = y + b
    return y


def layer_norm(x, g, b, eps=1e-5):
    mu = jnp.mean(x, axis=-1, keepdims=True)
    var = jnp.mean((x - mu) ** 2, axis=-1, keepdims=True)
    return (x - mu) / jnp.sqrt(var + eps) * g + b


def repr_6d_to_rotation_matrix(y):
    a1, a2 = y[..., 0:3], y[..., 3:6]
    b1 = a1 / (jnp.linalg.norm(a1, axis=-1, keepdims=True) + 1e-8)
    a2p = a2 - jnp.sum(b1 * a2, axis=-1, keepdims=True) * b1
    b2 = a2p / (jnp.linalg.norm(a2p, axis=-1, keepdims=True) + 1e-8)
    b3 = jnp.cross(b1, b2)
    return jnp.stack([b1, b2, b3], axis=-1)   # (..., 3, 3_index)


def prepare_pair_inputs(ipa_params, pair_feat, mask, compute_dtype=jnp.bfloat16):
    """Pair / mask preprocessing constant across structure iterations.

    * Pre-folds the pair-bias projection into a per-head (N, H, Lq, Lk) bias (one XLA
      contraction for ALL iterations and heads), scaled by sqrt(1/3).
    * Folds the key/column mask (-INF) into that bias IN F32 before the bf16 cast, so
      the kernel never builds mask_pair (softmax is row-shift invariant, and rows with
      mask_row == 0 are zeroed on alpha afterwards — exactly the reference semantics).
    * Transposes z to (N, Lq, C, Lk) so the streamed quadratic tensor is lane-dense.
    """
    mask_f = mask.astype(jnp.float32)
    bias = jnp.einsum("nijc,hc->nhij", pair_feat, ipa_params["Wpair"]) * _SCALE3
    bias = bias - _INF * (1.0 - mask_f)[:, None, None, :]
    z_t = jnp.swapaxes(pair_feat, -1, -2)                      # (N, Lq, C, Lk)
    return {
        "bias": bias.astype(compute_dtype),
        "z_t": z_t.astype(compute_dtype),
        "mask_row": mask_f[:, :, None],                        # (N, L, 1)
        "mask_f": mask_f,
    }


def ipa_block(p, cfg, R, t, x, pair_prep, tq=None, compute_dtype=jnp.bfloat16):
    N, L, _ = x.shape
    H, Dqk, Dv, Pq, Pv, C = (cfg["H"], cfg["Dqk"], cfg["Dv"],
                             cfg["Pq"], cfg["Pv"], cfg["C"])

    # linear / point projections (O(L) glue)
    q = linear(x, p["Wq"]).reshape(N, L, H, Dqk)
    k = linear(x, p["Wk"]).reshape(N, L, H, Dqk)
    v = linear(x, p["Wv"]).reshape(N, L, H, Dv)
    qp = linear(x, p["Wqp"]).reshape(N, L, H * Pq, 3)
    kp = linear(x, p["Wkp"]).reshape(N, L, H * Pq, 3)
    vp = linear(x, p["Wvp"]).reshape(N, L, H * Pv, 3)
    qp_g = jnp.einsum("nlij,nlmj->nlmi", R, qp) + t[:, :, None, :]
    kp_g = jnp.einsum("nlij,nlmj->nlmi", R, kp) + t[:, :, None, :]
    vp_g = jnp.einsum("nlij,nlmj->nlmi", R, vp) + t[:, :, None, :]

    # per-head spatial coefficient folded into point scaling
    gamma = jax.nn.softplus(p["spatial_coef"])                       # (H,)
    coef = jnp.sqrt(gamma * np.sqrt(2.0 / (9.0 * Pq)) / 2.0)         # (H,)

    # head-major layouts; fuse node + spatial logits into one contraction
    q_hm = jnp.transpose(q, (0, 2, 1, 3)) * (1.0 / np.sqrt(Dqk))     # (N,H,L,Dqk)
    k_hm = jnp.transpose(k, (0, 2, 1, 3))
    v_hm = jnp.transpose(v, (0, 2, 1, 3))
    qs = jnp.transpose(qp_g.reshape(N, L, H, Pq * 3), (0, 2, 1, 3)) * coef[None, :, None, None]
    ks = jnp.transpose(kp_g.reshape(N, L, H, Pq * 3), (0, 2, 1, 3)) * coef[None, :, None, None]
    vp_hm = jnp.transpose(vp_g.reshape(N, L, H, Pv * 3), (0, 2, 1, 3))

    qs_sq = jnp.sum(qs * qs, axis=-1, keepdims=True)
    ks_sq = jnp.sum(ks * ks, axis=-1, keepdims=True)
    ones = jnp.ones_like(qs_sq)
    # qf . kf = q.k/sqrt(d) + 2 qs.ks - |qs|^2 - |ks|^2 = logits_node + logits_spatial
    qf = _SCALE3 * jnp.concatenate([q_hm, _SQRT2 * qs, -qs_sq, ones], axis=-1)       # (N,H,L,Kf)
    # key-resident tensors stored lane-dense (L on the lane axis)
    kf = jnp.swapaxes(
        jnp.concatenate([k_hm, _SQRT2 * ks, ones, -ks_sq], axis=-1), -1, -2)         # (N,H,Kf,L)
    vf = jnp.swapaxes(jnp.concatenate([v_hm, vp_hm], axis=-1), -1, -2)               # (N,H,Dp,L)

    agg, p2n = ipa_attention_core(
        pair_prep["mask_row"],
        qf.astype(compute_dtype), kf.astype(compute_dtype), pair_prep["bias"],
        vf.astype(compute_dtype), pair_prep["z_t"], tq=tq)
    # agg: (N, L, H*(Dv+3Pv)) f32 head-major;  p2n: (N, L, H*C) f32 head-major.

    Dp = Dv + 3 * Pv
    agg_r = agg.reshape(N, L, H, Dp)
    feat_p2n = p2n                                                   # (N, L, H*C)
    feat_node = agg_r[..., :Dv].reshape(N, L, H * Dv)
    aggr_pts = agg_r[..., Dv:].reshape(N, L, H, Pv, 3)

    # spatial features (global->local, norms, directions)
    local_pts = jnp.einsum("nlji,nlhpj->nlhpi", R,
                           aggr_pts - t[:, :, None, None, :])
    dist = jnp.linalg.norm(local_pts, axis=-1)                       # (N, L, H, Pv)
    direction = local_pts / (jnp.linalg.norm(local_pts, axis=-1, keepdims=True) + 1e-4)
    feat_spatial = jnp.concatenate(
        [local_pts.reshape(N, L, -1), dist.reshape(N, L, -1),
         direction.reshape(N, L, -1)], axis=-1)

    feat_all = jnp.concatenate([feat_p2n, feat_node, feat_spatial], axis=-1)
    feat_all = linear(feat_all, p["Wout"], p["bout"])
    feat_all = jnp.where(pair_prep["mask_f"][:, :, None] > 0.5, feat_all, 0.0)
    return layer_norm(x + feat_all, p["ln1_g"], p["ln1_b"])


def rigid_update(params, cfg, R, t, x, pair_prep, tq=None):
    t = t * 0.1                                                      # angstrom -> nm
    x = ipa_block(params["ipa"], cfg, R, t, x, pair_prep, tq=tq)

    h = jax.nn.relu(linear(x, params["mlp_W1"], params["mlp_b1"]))
    h = jax.nn.relu(linear(h, params["mlp_W2"], params["mlp_b2"]))
    h = linear(h, params["mlp_W3"], params["mlp_b3"])
    x = layer_norm(x + h, params["ln2_g"], params["ln2_b"])

    y = linear(x, params["Wrt"], params["brt"])                      # (N, L, 9), 6d repr
    R_delta = repr_6d_to_rotation_matrix(y[..., 0:6])
    t_delta = y[..., 6:9]
    R_new = jnp.einsum("nlij,nljk->nlik", R, R_delta)
    t_new = jnp.einsum("nlij,nlj->nli", R, t_delta) + t
    t_new = t_new * 10.0                                             # nm -> angstrom
    return R_new, t_new, x


def iterative_shared_rigid_update(params, cfg, node_feat, pair_feat, mask_seq,
                                  num_iters, R_init=None, t_init=None, tq=None):
    N, L, _ = node_feat.shape
    if R_init is None:
        R_init = jnp.broadcast_to(jnp.eye(3, dtype=node_feat.dtype), (N, L, 3, 3))
    if t_init is None:
        t_init = jnp.zeros((N, L, 3), node_feat.dtype)

    # pair-feature prep (bias pre-fold + key-mask fold, z transpose, bf16 casts, masks)
    # hoisted out of the iteration loop
    pair_prep = prepare_pair_inputs(params["ipa"], pair_feat, mask_seq)

    R, t, x = R_init, t_init, node_feat
    R_traj, t_traj = [], []
    for _ in range(num_iters):
        R, t, x = rigid_update(params, cfg, R, t, x, pair_prep, tq=tq)
        R_traj.append(R)
        t_traj.append(t)
    return {"R": R, "t": t, "R_traj": R_traj, "t_traj": t_traj, "node_feat": x}


# ----------------------------------------------------------------------------- #
# Deterministic parameter init (synthetic; mirrors module __init__ shapes)
# ----------------------------------------------------------------------------- #
def init_params(key, cfg):
    F, C = cfg["F"], cfg["C"]
    H, Dqk, Dv, Pq, Pv = cfg["H"], cfg["Dqk"], cfg["Dv"], cfg["Pq"], cfg["Pv"]
    keys = jax.random.split(key, 12)

    def lin_w(k, out_d, in_d):
        bound = 1.0 / np.sqrt(in_d)
        return jax.random.uniform(k, (out_d, in_d), jnp.float32, -bound, bound)

    out_in = H * C + H * Dv + H * Pv * (3 + 3 + 1)
    ipa = {
        "Wq": lin_w(keys[0], H * Dqk, F),
        "Wk": lin_w(keys[1], H * Dqk, F),
        "Wv": lin_w(keys[2], H * Dv, F),
        "Wpair": lin_w(keys[3], H, C),
        "spatial_coef": jnp.full((H,), float(np.log(np.exp(1.0) - 1.0)), jnp.float32),
        "Wqp": lin_w(keys[4], H * Pq * 3, F),
        "Wkp": lin_w(keys[5], H * Pq * 3, F),
        "Wvp": lin_w(keys[6], H * Pv * 3, F),
        "Wout": lin_w(keys[7], F, out_in),
        "bout": jnp.zeros((F,), jnp.float32),
        "ln1_g": jnp.ones((F,), jnp.float32),
        "ln1_b": jnp.zeros((F,), jnp.float32),
    }
    return {
        "ipa": ipa,
        "mlp_W1": lin_w(keys[8], F, F), "mlp_b1": jnp.zeros((F,), jnp.float32),
        "mlp_W2": lin_w(keys[9], F, F), "mlp_b2": jnp.zeros((F,), jnp.float32),
        "mlp_W3": lin_w(keys[10], F, F), "mlp_b3": jnp.zeros((F,), jnp.float32),
        "ln2_g": jnp.ones((F,), jnp.float32), "ln2_b": jnp.zeros((F,), jnp.float32),
        "Wrt": lin_w(keys[11], 9, F) * 0.1, "brt": jnp.zeros((9,), jnp.float32),
    }


# ----------------------------------------------------------------------------- #
if __name__ == "__main__":
    # small shapes consistent with the module's forward
    cfg = {"F": 32, "C": 8, "H": 4, "Dqk": 8, "Dv": 8, "Pq": 4, "Pv": 4}
    N, L = 2, 16
    num_iters = 2

    key = jax.random.PRNGKey(0)
    k_param, k_node, k_pair = jax.random.split(key, 3)
    params = init_params(k_param, cfg)

    node_feat = jax.random.normal(k_node, (N, L, cfg["F"]), jnp.float32)
    pair_feat = jax.random.normal(k_pair, (N, L, L, cfg["C"]), jnp.float32)
    mask_seq = jnp.broadcast_to(jnp.arange(L)[None, :] < (L - 2), (N, L))

    # tq=8 exercises the query-tile grid axis (grid = (N, L // tq) = (2, 2)).
    out = iterative_shared_rigid_update(params, cfg, node_feat, pair_feat,
                                        mask_seq, num_iters, tq=8)
    jax.block_until_ready(out["node_feat"])
    jax.block_until_ready(out["R"])
    jax.block_until_ready(out["t"])

    assert out["R"].shape == (N, L, 3, 3)
    assert out["t"].shape == (N, L, 3)
    assert out["node_feat"].shape == (N, L, cfg["F"])
    assert len(out["R_traj"]) == num_iters and len(out["t_traj"]) == num_iters
    assert bool(jnp.isfinite(out["node_feat"]).all())
    assert bool(jnp.isfinite(out["t"]).all())
    assert bool(jnp.isfinite(out["R"]).all())
    print("KERNEL_OK")
</pallas_src>

<mosaic_0001>
module attributes {stable_mosaic.version = 11 : i64} {
  func.func @ipa_attn_kernel(%arg0: i32, %arg1: i32, %arg2: memref<1x4x8x22xbf16, #tpu.memory_space<vmem>>, %arg3: memref<1x4x22x16xbf16, #tpu.memory_space<vmem>>, %arg4: memref<1x4x8x16xbf16, #tpu.memory_space<vmem>>, %arg5: memref<1x4x20x16xbf16, #tpu.memory_space<vmem>>, %arg6: memref<1x8x8x16xbf16, #tpu.memory_space<vmem>>, %arg7: memref<1x8x1xf32, #tpu.memory_space<vmem>>, %arg8: memref<1x8x80xf32, #tpu.memory_space<vmem>>, %arg9: memref<1x8x32xf32, #tpu.memory_space<vmem>>) attributes {dimension_semantics = [#tpu.dimension_semantics<parallel>, #tpu.dimension_semantics<parallel>], iteration_bounds = array<i64: 2, 2>, scalar_prefetch = 0 : i64, scratch_operands = 0 : i64, tpu.core_type = #tpu.core_type<tc>, window_params = [{transform_indices = @transform_0, window_bounds = array<i64: 1, 4, 8, 22>}, {transform_indices = @transform_1, window_bounds = array<i64: 1, 4, 22, 16>}, {transform_indices = @transform_2, window_bounds = array<i64: 1, 4, 8, 16>}, {transform_indices = @transform_3, window_bounds = array<i64: 1, 4, 20, 16>}, {transform_indices = @transform_4, window_bounds = array<i64: 1, 8, 8, 16>}, {transform_indices = @transform_5, window_bounds = array<i64: 1, 8, 1>}, {transform_indices = @transform_6, window_bounds = array<i64: 1, 8, 80>}, {transform_indices = @transform_7, window_bounds = array<i64: 1, 8, 32>}]} {
    %c0 = arith.constant 0 : index
    %c0_0 = arith.constant 0 : index
    %c0_1 = arith.constant 0 : index
    %0 = vector.load %arg7[%c0, %c0_0, %c0_1] : memref<1x8x1xf32, #tpu.memory_space<vmem>>, vector<1x8x1xf32>
    %1 = vector.shape_cast %0 : vector<1x8x1xf32> to vector<8x1xf32>
    %cst = arith.constant 5.000000e-01 : f32
    %2 = vector.broadcast %cst : f32 to vector<8x1xf32>
    %3 = arith.cmpf ogt, %1, %2 : vector<8x1xf32>
    %c0_2 = arith.constant 0 : index
    %c0_3 = arith.constant 0 : index
    %c0_4 = arith.constant 0 : index
    %c0_5 = arith.constant 0 : index
    %4 = vector.load %arg6[%c0_2, %c0_3, %c0_4, %c0_5] : memref<1x8x8x16xbf16, #tpu.memory_space<vmem>>, vector<1x8x8x16xbf16>
    %5 = vector.shape_cast %4 : vector<1x8x8x16xbf16> to vector<8x8x16xbf16>
    %c0_6 = arith.constant 0 : index
    %c0_7 = arith.constant 0 : index
    %c0_8 = arith.constant 0 : index
    %c0_9 = arith.constant 0 : index
    %6 = vector.load %arg2[%c0_6, %c0_7, %c0_8, %c0_9] : memref<1x4x8x22xbf16, #tpu.memory_space<vmem>>, vector<1x1x8x22xbf16>
    %7 = vector.shape_cast %6 : vector<1x1x8x22xbf16> to vector<8x22xbf16>
    %c0_10 = arith.constant 0 : index
    %c0_11 = arith.constant 0 : index
    %c0_12 = arith.constant 0 : index
    %c0_13 = arith.constant 0 : index
    %8 = vector.load %arg3[%c0_10, %c0_11, %c0_12, %c0_13] : memref<1x4x22x16xbf16, #tpu.memory_space<vmem>>, vector<1x1x22x16xbf16>
    %9 = vector.shape_cast %8 : vector<1x1x22x16xbf16> to vector<22x16xbf16>
    %cst_14 = arith.constant dense<0.000000e+00> : vector<8x16xf32>
    %10 = tpu.matmul %7, %9, %cst_14 {dimension_numbers = #tpu.dot_dimension_numbers<[1], [0], [0], [1], [0, 0, 1, 1], [], []>} : vector<8x22xbf16>, vector<22x16xbf16>, vector<8x16xf32> -> vector<8x16xf32>
    %c0_15 = arith.constant 0 : index
    %c0_16 = arith.constant 0 : index
    %c0_17 = arith.constant 0 : index
    %c0_18 = arith.constant 0 : index
    %11 = vector.load %arg4[%c0_15, %c0_16, %c0_17, %c0_18] : memref<1x4x8x16xbf16, #tpu.memory_space<vmem>>, vector<1x1x8x16xbf16>
    %12 = vector.shape_cast %11 : vector<1x1x8x16xbf16> to vector<8x16xbf16>
    %13 = arith.extf %12 : vector<8x16xbf16> to vector<8x16xf32>
    %14 = arith.addf %10, %13 : vector<8x16xf32>
    %cst_19 = arith.constant dense<0xFF800000> : vector<8xf32>
    %15 = vector.multi_reduction <maximumf>, %14, %cst_19 [1] : vector<8x16xf32> to vector<8xf32>
    %16 = vector.shape_cast %15 : vector<8xf32> to vector<8x1xf32>
    %17 = vector.broadcast %16 : vector<8x1xf32> to vector<8x16xf32>
    %18 = arith.subf %14, %17 : vector<8x16xf32>
    %19 = math.exp %18 : vector<8x16xf32>
    %cst_20 = arith.constant dense<0.000000e+00> : vector<8xf32>
    %20 = vector.multi_reduction <add>, %19, %cst_20 [1] : vector<8x16xf32> to vector<8xf32>
    %21 = vector.shape_cast %20 : vector<8xf32> to vector<8x1xf32>
    %22 = tpu.reciprocal %21 {approx = true} : vector<8x1xf32> -> vector<8x1xf32>
    %23 = vector.broadcast %22 : vector<8x1xf32> to vector<8x16xf32>
    %24 = arith.mulf %19, %23 : vector<8x16xf32>
    %cst_21 = arith.constant 0.000000e+00 : f32
    %25 = vector.shape_cast %3 : vector<8x1xi1> to vector<8x1xi1>
    %26 = vector.broadcast %25 : vector<8x1xi1> to vector<8x16xi1>
    %27 = vector.broadcast %cst_21 : f32 to vector<8x16xf32>
    %28 = arith.select %26, %24, %27 : vector<8x16xi1>, vector<8x16xf32>
    %29 = arith.truncf %28 : vector<8x16xf32> to vector<8x16xbf16>
    %c0_22 = arith.constant 0 : index
    %c0_23 = arith.constant 0 : index
    %c0_24 = arith.constant 0 : index
    %c0_25 = arith.constant 0 : index
    %30 = vector.load %arg5[%c0_22, %c0_23, %c0_24, %c0_25] : memref<1x4x20x16xbf16, #tpu.memory_space<vmem>>, vector<1x1x20x16xbf16>
    %31 = vector.shape_cast %30 : vector<1x1x20x16xbf16> to vector<20x16xbf16>
    %cst_26 = arith.constant dense<0.000000e+00> : vector<8x20xf32>
    %32 = tpu.matmul %29, %31, %cst_26 {dimension_numbers = #tpu.dot_dimension_numbers<[1], [1], [0], [0], [0, 0, 1, 0], [], []>} : vector<8x16xbf16>, vector<20x16xbf16>, vector<8x20xf32> -> vector<8x20xf32>
    %33 = vector.shape_cast %28 : vector<8x16xf32> to vector<8x1x16xf32>
    %34 = arith.extf %5 : vector<8x8x16xbf16> to vector<8x8x16xf32>
    %35 = vector.broadcast %33 : vector<8x1x16xf32> to vector<8x8x16xf32>
    %36 = arith.mulf %35, %34 : vector<8x8x16xf32>
    %cst_27 = arith.constant dense<0.000000e+00> : vector<8x8xf32>
    %37 = vector.multi_reduction <add>, %36, %cst_27 [2] : vector<8x8x16xf32> to vector<8x8xf32>
    %c0_28 = arith.constant 0 : index
    %c1 = arith.constant 1 : index
    %c0_29 = arith.constant 0 : index
    %c0_30 = arith.constant 0 : index
    %38 = vector.load %arg2[%c0_28, %c1, %c0_29, %c0_30] : memref<1x4x8x22xbf16, #tpu.memory_space<vmem>>, vector<1x1x8x22xbf16>
    %39 = vector.shape_cast %38 : vector<1x1x8x22xbf16> to vector<8x22xbf16>
    %c0_31 = arith.constant 0 : index
    %c1_32 = arith.constant 1 : index
    %c0_33 = arith.constant 0 : index
    %c0_34 = arith.constant 0 : index
    %40 = vector.load %arg3[%c0_31, %c1_32, %c0_33, %c0_34] : memref<1x4x22x16xbf16, #tpu.memory_space<vmem>>, vector<1x1x22x16xbf16>
    %41 = vector.shape_cast %40 : vector<1x1x22x16xbf16> to vector<22x16xbf16>
    %cst_35 = arith.constant dense<0.000000e+00> : vector<8x16xf32>
    %42 = tpu.matmul %39, %41, %cst_35 {dimension_numbers = #tpu.dot_dimension_numbers<[1], [0], [0], [1], [0, 0, 1, 1], [], []>} : vector<8x22xbf16>, vector<22x16xbf16>, vector<8x16xf32> -> vector<8x16xf32>
    %c0_36 = arith.constant 0 : index
    %c1_37 = arith.constant 1 : index
    %c0_38 = arith.constant 0 : index
    %c0_39 = arith.constant 0 : index
    %43 = vector.load %arg4[%c0_36, %c1_37, %c0_38, %c0_39] : memref<1x4x8x16xbf16, #tpu.memory_space<vmem>>, vector<1x1x8x16xbf16>
    %44 = vector.shape_cast %43 : vector<1x1x8x16xbf16> to vector<8x16xbf16>
    %45 = arith.extf %44 : vector<8x16xbf16> to vector<8x16xf32>
    %46 = arith.addf %42, %45 : vector<8x16xf32>
    %cst_40 = arith.constant dense<0xFF800000> : vector<8xf32>
    %47 = vector.multi_reduction <maximumf>, %46, %cst_40 [1] : vector<8x16xf32> to vector<8xf32>
    %48 = vector.shape_cast %47 : vector<8xf32> to vector<8x1xf32>
    %49 = vector.broadcast %48 : vector<8x1xf32> to vector<8x16xf32>
    %50 = arith.subf %46, %49 : vector<8x16xf32>
    %51 = math.exp %50 : vector<8x16xf32>
    %cst_41 = arith.constant dense<0.000000e+00> : vector<8xf32>
    %52 = vector.multi_reduction <add>, %51, %cst_41 [1] : vector<8x16xf32> to vector<8xf32>
    %53 = vector.shape_cast %52 : vector<8xf32> to vector<8x1xf32>
    %54 = tpu.reciprocal %53 {approx = true} : vector<8x1xf32> -> vector<8x1xf32>
    %55 = vector.broadcast %54 : vector<8x1xf32> to vector<8x16xf32>
    %56 = arith.mulf %51, %55 : vector<8x16xf32>
    %cst_42 = arith.constant 0.000000e+00 : f32
    %57 = vector.shape_cast %3 : vector<8x1xi1> to vector<8x1xi1>
    %58 = vector.broadcast %57 : vector<8x1xi1> to vector<8x16xi1>
    %59 = vector.broadcast %cst_42 : f32 to vector<8x16xf32>
    %60 = arith.select %58, %56, %59 : vector<8x16xi1>, vector<8x16xf32>
    %61 = arith.truncf %60 : vector<8x16xf32> to vector<8x16xbf16>
    %c0_43 = arith.constant 0 : index
    %c1_44 = arith.constant 1 : index
    %c0_45 = arith.constant 0 : index
    %c0_46 = arith.constant 0 : index
    %62 = vector.load %arg5[%c0_43, %c1_44, %c0_45, %c0_46] : memref<1x4x20x16xbf16, #tpu.memory_space<vmem>>, vector<1x1x20x16xbf16>
    %63 = vector.shape_cast %62 : vector<1x1x20x16xbf16> to vector<20x16xbf16>
    %cst_47 = arith.constant dense<0.000000e+00> : vector<8x20xf32>
    %64 = tpu.matmul %61, %63, %cst_47 {dimension_numbers = #tpu.dot_dimension_numbers<[1], [1], [0], [0], [0, 0, 1, 0], [], []>} : vector<8x16xbf16>, vector<20x16xbf16>, vector<8x20xf32> -> vector<8x20xf32>
    %65 = vector.shape_cast %60 : vector<8x16xf32> to vector<8x1x16xf32>
    %66 = arith.extf %5 : vector<8x8x16xbf16> to vector<8x8x16xf32>
    %67 = vector.broadcast %65 : vector<8x1x16xf32> to vector<8x8x16xf32>
    %68 = arith.mulf %67, %66 : vector<8x8x16xf32>
    %cst_48 = arith.constant dense<0.000000e+00> : vector<8x8xf32>
    %69 = vector.multi_reduction <add>, %68, %cst_48 [2] : vector<8x8x16xf32> to vector<8x8xf32>
    %c0_49 = arith.constant 0 : index
    %c2 = arith.constant 2 : index
    %c0_50 = arith.constant 0 : index
    %c0_51 = arith.constant 0 : index
    %70 = vector.load %arg2[%c0_49, %c2, %c0_50, %c0_51] : memref<1x4x8x22xbf16, #tpu.memory_space<vmem>>, vector<1x1x8x22xbf16>
    %71 = vector.shape_cast %70 : vector<1x1x8x22xbf16> to vector<8x22xbf16>
    %c0_52 = arith.constant 0 : index
    %c2_53 = arith.constant 2 : index
    %c0_54 = arith.constant 0 : index
    %c0_55 = arith.constant 0 : index
    %72 = vector.load %arg3[%c0_52, %c2_53, %c0_54, %c0_55] : memref<1x4x22x16xbf16, #tpu.memory_space<vmem>>, vector<1x1x22x16xbf16>
    %73 = vector.shape_cast %72 : vector<1x1x22x16xbf16> to vector<22x16xbf16>
    %cst_56 = arith.constant dense<0.000000e+00> : vector<8x16xf32>
    %74 = tpu.matmul %71, %73, %cst_56 {dimension_numbers = #tpu.dot_dimension_numbers<[1], [0], [0], [1], [0, 0, 1, 1], [], []>} : vector<8x22xbf16>, vector<22x16xbf16>, vector<8x16xf32> -> vector<8x16xf32>
    %c0_57 = arith.constant 0 : index
    %c2_58 = arith.constant 2 : index
    %c0_59 = arith.constant 0 : index
    %c0_60 = arith.constant 0 : index
    %75 = vector.load %arg4[%c0_57, %c2_58, %c0_59, %c0_60] : memref<1x4x8x16xbf16, #tpu.memory_space<vmem>>, vector<1x1x8x16xbf16>
    %76 = vector.shape_cast %75 : vector<1x1x8x16xbf16> to vector<8x16xbf16>
    %77 = arith.extf %76 : vector<8x16xbf16> to vector<8x16xf32>
    %78 = arith.addf %74, %77 : vector<8x16xf32>
    %cst_61 = arith.constant dense<0xFF800000> : vector<8xf32>
    %79 = vector.multi_reduction <maximumf>, %78, %cst_61 [1] : vector<8x16xf32> to vector<8xf32>
    %80 = vector.shape_cast %79 : vector<8xf32> to vector<8x1xf32>
    %81 = vector.broadcast %80 : vector<8x1xf32> to vector<8x16xf32>
    %82 = arith.subf %78, %81 : vector<8x16xf32>
    %83 = math.exp %82 : vector<8x16xf32>
    %cst_62 = arith.constant dense<0.000000e+00> : vector<8xf32>
    %84 = vector.multi_reduction <add>, %83, %cst_62 [1] : vector<8x16xf32> to vector<8xf32>
    %85 = vector.shape_cast %84 : vector<8xf32> to vector<8x1xf32>
    %86 = tpu.reciprocal %85 {approx = true} : vector<8x1xf32> -> vector<8x1xf32>
    %87 = vector.broadcast %86 : vector<8x1xf32> to vector<8x16xf32>
    %88 = arith.mulf %83, %87 : vector<8x16xf32>
    %cst_63 = arith.constant 0.000000e+00 : f32
    %89 = vector.shape_cast %3 : vector<8x1xi1> to vector<8x1xi1>
    %90 = vector.broadcast %89 : vector<8x1xi1> to vector<8x16xi1>
    %91 = vector.broadcast %cst_63 : f32 to vector<8x16xf32>
    %92 = arith.select %90, %88, %91 : vector<8x16xi1>, vector<8x16xf32>
    %93 = arith.truncf %92 : vector<8x16xf32> to vector<8x16xbf16>
    %c0_64 = arith.constant 0 : index
    %c2_65 = arith.constant 2 : index
    %c0_66 = arith.constant 0 : index
    %c0_67 = arith.constant 0 : index
    %94 = vector.load %arg5[%c0_64, %c2_65, %c0_66, %c0_67] : memref<1x4x20x16xbf16, #tpu.memory_space<vmem>>, vector<1x1x20x16xbf16>
    %95 = vector.shape_cast %94 : vector<1x1x20x16xbf16> to vector<20x16xbf16>
    %cst_68 = arith.constant dense<0.000000e+00> : vector<8x20xf32>
    %96 = tpu.matmul %93, %95, %cst_68 {dimension_numbers = #tpu.dot_dimension_numbers<[1], [1], [0], [0], [0, 0, 1, 0], [], []>} : vector<8x16xbf16>, vector<20x16xbf16>, vector<8x20xf32> -> vector<8x20xf32>
    %97 = vector.shape_cast %92 : vector<8x16xf32> to vector<8x1x16xf32>
    %98 = arith.extf %5 : vector<8x8x16xbf16> to vector<8x8x16xf32>
    %99 = vector.broadcast %97 : vector<8x1x16xf32> to vector<8x8x16xf32>
    %100 = arith.mulf %99, %98 : vector<8x8x16xf32>
    %cst_69 = arith.constant dense<0.000000e+00> : vector<8x8xf32>
    %101 = vector.multi_reduction <add>, %100, %cst_69 [2] : vector<8x8x16xf32> to vector<8x8xf32>
    %c0_70 = arith.constant 0 : index
    %c3 = arith.constant 3 : index
    %c0_71 = arith.constant 0 : index
    %c0_72 = arith.constant 0 : index
    %102 = vector.load %arg2[%c0_70, %c3, %c0_71, %c0_72] : memref<1x4x8x22xbf16, #tpu.memory_space<vmem>>, vector<1x1x8x22xbf16>
    %103 = vector.shape_cast %102 : vector<1x1x8x22xbf16> to vector<8x22xbf16>
    %c0_73 = arith.constant 0 : index
    %c3_74 = arith.constant 3 : index
    %c0_75 = arith.constant 0 : index
    %c0_76 = arith.constant 0 : index
    %104 = vector.load %arg3[%c0_73, %c3_74, %c0_75, %c0_76] : memref<1x4x22x16xbf16, #tpu.memory_space<vmem>>, vector<1x1x22x16xbf16>
    %105 = vector.shape_cast %104 : vector<1x1x22x16xbf16> to vector<22x16xbf16>
    %cst_77 = arith.constant dense<0.000000e+00> : vector<8x16xf32>
    %106 = tpu.matmul %103, %105, %cst_77 {dimension_numbers = #tpu.dot_dimension_numbers<[1], [0], [0], [1], [0, 0, 1, 1], [], []>} : vector<8x22xbf16>, vector<22x16xbf16>, vector<8x16xf32> -> vector<8x16xf32>
    %c0_78 = arith.constant 0 : index
    %c3_79 = arith.constant 3 : index
    %c0_80 = arith.constant 0 : index
    %c0_81 = arith.constant 0 : index
    %107 = vector.load %arg4[%c0_78, %c3_79, %c0_80, %c0_81] : memref<1x4x8x16xbf16, #tpu.memory_space<vmem>>, vector<1x1x8x16xbf16>
    %108 = vector.shape_cast %107 : vector<1x1x8x16xbf16> to vector<8x16xbf16>
    %109 = arith.extf %108 : vector<8x16xbf16> to vector<8x16xf32>
    %110 = arith.addf %106, %109 : vector<8x16xf32>
    %cst_82 = arith.constant dense<0xFF800000> : vector<8xf32>
    %111 = vector.multi_reduction <maximumf>, %110, %cst_82 [1] : vector<8x16xf32> to vector<8xf32>
    %112 = vector.shape_cast %111 : vector<8xf32> to vector<8x1xf32>
    %113 = vector.broadcast %112 : vector<8x1xf32> to vector<8x16xf32>
    %114 = arith.subf %110, %113 : vector<8x16xf32>
    %115 = math.exp %114 : vector<8x16xf32>
    %cst_83 = arith.constant dense<0.000000e+00> : vector<8xf32>
    %116 = vector.multi_reduction <add>, %115, %cst_83 [1] : vector<8x16xf32> to vector<8xf32>
    %117 = vector.shape_cast %116 : vector<8xf32> to vector<8x1xf32>
    %118 = tpu.reciprocal %117 {approx = true} : vector<8x1xf32> -> vector<8x1xf32>
    %119 = vector.broadcast %118 : vector<8x1xf32> to vector<8x16xf32>
    %120 = arith.mulf %115, %119 : vector<8x16xf32>
    %cst_84 = arith.constant 0.000000e+00 : f32
    %121 = vector.shape_cast %3 : vector<8x1xi1> to vector<8x1xi1>
    %122 = vector.broadcast %121 : vector<8x1xi1> to vector<8x16xi1>
    %123 = vector.broadcast %cst_84 : f32 to vector<8x16xf32>
    %124 = arith.select %122, %120, %123 : vector<8x16xi1>, vector<8x16xf32>
    %125 = arith.truncf %124 : vector<8x16xf32> to vector<8x16xbf16>
    %c0_85 = arith.constant 0 : index
    %c3_86 = arith.constant 3 : index
    %c0_87 = arith.constant 0 : index
    %c0_88 = arith.constant 0 : index
    %126 = vector.load %arg5[%c0_85, %c3_86, %c0_87, %c0_88] : memref<1x4x20x16xbf16, #tpu.memory_space<vmem>>, vector<1x1x20x16xbf16>
    %127 = vector.shape_cast %126 : vector<1x1x20x16xbf16> to vector<20x16xbf16>
    %cst_89 = arith.constant dense<0.000000e+00> : vector<8x20xf32>
    %128 = tpu.matmul %125, %127, %cst_89 {dimension_numbers = #tpu.dot_dimension_numbers<[1], [1], [0], [0], [0, 0, 1, 0], [], []>} : vector<8x16xbf16>, vector<20x16xbf16>, vector<8x20xf32> -> vector<8x20xf32>
    %129 = vector.shape_cast %124 : vector<8x16xf32> to vector<8x1x16xf32>
    %130 = arith.extf %5 : vector<8x8x16xbf16> to vector<8x8x16xf32>
    %131 = vector.broadcast %129 : vector<8x1x16xf32> to vector<8x8x16xf32>
    %132 = arith.mulf %131, %130 : vector<8x8x16xf32>
    %cst_90 = arith.constant dense<0.000000e+00> : vector<8x8xf32>
    %133 = vector.multi_reduction <add>, %132, %cst_90 [2] : vector<8x8x16xf32> to vector<8x8xf32>
    %134 = tpu.concatenate %32, %64, %96, %128 in 1 : vector<8x20xf32>, vector<8x20xf32>, vector<8x20xf32>, vector<8x20xf32> -> vector<8x80xf32>
    %c0_91 = arith.constant 0 : index
    %c0_92 = arith.constant 0 : index
    %c0_93 = arith.constant 0 : index
    %135 = vector.load %arg8[%c0_91, %c0_92, %c0_93] : memref<1x8x80xf32, #tpu.memory_space<vmem>>, vector<1x8x80xf32>
    %136 = vector.shape_cast %135 : vector<1x8x80xf32> to vector<8x80xf32>
    %137 = vector.shape_cast %134 : vector<8x80xf32> to vector<1x8x80xf32>
    tpu.vector_store %arg8[%c0_91, %c0_92, %c0_93], %137 {strides = array<i32>} : memref<1x8x80xf32, #tpu.memory_space<vmem>>, vector<1x8x80xf32>,
    %138 = tpu.concatenate %37, %69, %101, %133 in 1 : vector<8x8xf32>, vector<8x8xf32>, vector<8x8xf32>, vector<8x8xf32> -> vector<8x32xf32>
    %c0_94 = arith.constant 0 : index
    %c0_95 = arith.constant 0 : index
    %c0_96 = arith.constant 0 : index
    %139 = vector.load %arg9[%c0_94, %c0_95, %c0_96] : memref<1x8x32xf32, #tpu.memory_space<vmem>>, vector<1x8x32xf32>
    %140 = vector.shape_cast %139 : vector<1x8x32xf32> to vector<8x32xf32>
    %141 = vector.shape_cast %138 : vector<8x32xf32> to vector<1x8x32xf32>
    tpu.vector_store %arg9[%c0_94, %c0_95, %c0_96], %141 {strides = array<i32>} : memref<1x8x32xf32, #tpu.memory_space<vmem>>, vector<1x8x32xf32>,
    return
  }
  func.func @transform_0(%arg0: i32, %arg1: i32) -> (i32, i32, i32, i32) {
    %c0_i32 = arith.constant 0 : i32
    %c0_i32_0 = arith.constant 0 : i32
    %c0_i32_1 = arith.constant 0 : i32
    return %arg0, %c0_i32, %arg1, %c0_i32_0 : i32, i32, i32, i32
  }
  func.func @transform_1(%arg0: i32, %arg1: i32) -> (i32, i32, i32, i32) {
    %c0_i32 = arith.constant 0 : i32
    %c0_i32_0 = arith.constant 0 : i32
    %c0_i32_1 = arith.constant 0 : i32
    %c0_i32_2 = arith.constant 0 : i32
    return %arg0, %c0_i32, %c0_i32_0, %c0_i32_1 : i32, i32, i32, i32
  }
  func.func @transform_2(%arg0: i32, %arg1: i32) -> (i32, i32, i32, i32) {
    %c0_i32 = arith.constant 0 : i32
    %c0_i32_0 = arith.constant 0 : i32
    %c0_i32_1 = arith.constant 0 : i32
    return %arg0, %c0_i32, %arg1, %c0_i32_0 : i32, i32, i32, i32
  }
  func.func @transform_3(%arg0: i32, %arg1: i32) -> (i32, i32, i32, i32) {
    %c0_i32 = arith.constant 0 : i32
    %c0_i32_0 = arith.constant 0 : i32
    %c0_i32_1 = arith.constant 0 : i32
    %c0_i32_2 = arith.constant 0 : i32
    return %arg0, %c0_i32, %c0_i32_0, %c0_i32_1 : i32, i32, i32, i32
  }
  func.func @transform_4(%arg0: i32, %arg1: i32) -> (i32, i32, i32, i32) {
    %c0_i32 = arith.constant 0 : i32
    %c0_i32_0 = arith.constant 0 : i32
    %c0_i32_1 = arith.constant 0 : i32
    return %arg0, %arg1, %c0_i32, %c0_i32_0 : i32, i32, i32, i32
  }
  func.func @transform_5(%arg0: i32, %arg1: i32) -> (i32, i32, i32) {
    %c0_i32 = arith.constant 0 : i32
    %c0_i32_0 = arith.constant 0 : i32
    return %arg0, %arg1, %c0_i32 : i32, i32, i32
  }
  func.func @transform_6(%arg0: i32, %arg1: i32) -> (i32, i32, i32) {
    %c0_i32 = arith.constant 0 : i32
    %c0_i32_0 = arith.constant 0 : i32
    return %arg0, %arg1, %c0_i32 : i32, i32, i32
  }
  func.func @transform_7(%arg0: i32, %arg1: i32) -> (i32, i32, i32) {
    %c0_i32 = arith.constant 0 : i32
    %c0_i32_0 = arith.constant 0 : i32
    return %arg0, %arg1, %c0_i32 : i32, i32, i32
  }
}

</mosaic_0001>

<bundles_post_ra>
// kernel: tpu_custom_call.1
= control target key start
LH: loop header
LB: loop body
LE: loop exit
PB: predicated region body
PF: predicated region fallthrough
CT: control target
= control target key end

     0   :  { %s3124_s0 = inlined_call_operand.vmem [shape: bf16[2,4,16,22], index: 0, kind: input, shape index: {}]   ;;  %s3125_s1 = inlined_call_operand.vmem [shape: bf16[2,4,22,16], index: 1, kind: input, shape index: {}]   ;;  %s3126_s2 = inlined_call_operand.vmem [shape: bf16[2,4,16,16], index: 2, kind: input, shape index: {}]   ;;  %s3127_s3 = inlined_call_operand.vmem [shape: bf16[2,4,20,16], index: 3, kind: input, shape index: {}]   ;;  %s3128_s4 = inlined_call_operand.vmem [shape: bf16[2,16,8,16], index: 4, kind: input, shape index: {}]   ;;  %s3129_s5 = inlined_call_operand.vmem [shape: f32[2,16,1], index: 5, kind: input, shape index: {}]   ;;  %s3130_s6 = inlined_call_operand.hbm [shape: f32[2,16,80], index: 6, kind: output, shape index: {0}]   ;;  %s3131_s7 = inlined_call_operand.hbm [shape: f32[2,16,32], index: 7, kind: output, shape index: {1}]  }
   0x1   :  { %3135 = sst [smem:[#allocation11_spill]] %s3124_s0 }
   0x2   :  { %13 = vsyncpa [#allocation5], 0 }
   0x3   :  { %15 = vsyncpa [#allocation5 + $0x1], 0 }
   0x4   :  { %16 = vsyncpa [#allocation7], 0 }
   0x5   :  { %18 = vsyncpa [#allocation7 + $0x1], 0  ;;  %s2548_s24 = smov 0   ;;  %s2550_s25 = smov 0  }
   0x6   :  { %s2552_s26 = smov 0   ;;  %s2554_s27 = smov 0  }
   0x7   :  { %s2556_s28 = smov 0   ;;  %s2558_s29 = smov 0  }
   0x8   :  { %s2560_s30 = smov 0   ;;  %s2562_s8 = smov 0  }
   0x9 LB: > { %s2069_s9 = sadd.s32 4294967295, %s2497_s8   ;;  %s2070_s10 = sadd.s32 4294967294, %s2497_s8   ;;  %s2497_s8 = sphi %s2562_s8, %s24_s8   ;;  %s2493_s30 = sphi %s2560_s30, %s3150_s30   ;;  %s2489_s29 = sphi %s2558_s29, %s3149_s29   ;;  %s2485_s28 = sphi %s2556_s28, %s3148_s28   ;;  %s2481_s27 = sphi %s2554_s27, %s3147_s27   ;;  %s2477_s26 = sphi %s2552_s26, %s3146_s26   ;;  %s2473_s25 = sphi %s2550_s25, %s3145_s25   ;;  %s2469_s24 = sphi %s2548_s24, %s3144_s24  }
   0xa   : > { %s33_s11 = sadd.s32 1, %s2489_s29  ;;  %s36_s12 = sadd.s32 1, %s2493_s30 }
   0xb   : > { %p34_p0 = scmp.ge.s32.totalorder %s33_s11, 2  ;;  %p52_p1 = scmp.ne.s32.totalorder %s2477_s26, %s2473_s25 }
   0xc   : > { %p53_p2 = scmp.eq.s32.totalorder %s2497_s8, 0  ;;  %p220_p5 = scmp.eq.s32.totalorder %s2069_s9, 3 }
   0xd   : > { %s3152_s11 = smov (%p34_p0, %s33_s11), 0  ;;  %s3154_s12 = smov (!%p34_p0, %s36_s12), %s2493_s30 }
   0xe   : > { %s41_s13 = ssub.s32 %s2489_s29, %s3152_s11  ;;  %p2600_p3 = por %p53_p2, %p52_p1 }
   0xf   : > { %p38_p4 = scmp.ge.s32.totalorder %s3154_s12, 2  ;;  %p225_p6 = scmp.ne.s32.totalorder %s2473_s25, %s2469_s24 }
  0x10   : > { %p226_p7 = scmp.eq.s32.totalorder %s2070_s10, 3  ;;  %p2608_p8 = por %p220_p5, %p52_p1 }
  0x11   : > { %s3156_s12 = smov (%p38_p4, %s3154_s12), 0  ;;  %s45_s19 = sadd.s32 1, %s2477_s26 }
  0x12   : > { %3137 = sst [smem:[#allocation10_spill]] %s3156_s12  ;;  %p2612_p9 = por %p226_p7, %p225_p6 }
  0x13   : > { %s40_s17 = ssub.s32 %s2493_s30, %s3156_s12  ;;  %p2072_p11 = scmp.ge.s32.totalorder %s2497_s8, 4 }
  0x14   : > { %s42_s18 = sor.u32 %s41_s13, %s40_s17 }
  0x15   : > { %p43_p10 = scmp.eq.s32.totalorder %s42_s18, 0  ;;  %270 = sbr.rel (%p2072_p11) target bundleno = 48 (0x30), region = 16 }
  0x17   : > { %s2620_s20 = scalar_select %p43_p10, %s2477_s26, %s45_s19  }
  0x1c   : > { %273 = sbr.rel (!%p2600_p3) target bundleno = 40 (0x28), region = 20  ;;  %s275_s21 = sand.u32 (%p2600_p3), 1, %s2477_s26  }
  0x1d   : > { %s2074_s22 = sshll.u32 (%p2600_p3), %s2493_s30, 3  ;;  %s2073_s23 = sshll.u32 (%p2600_p3), %s275_s21, 4 }
  0x1e   : > { %s279_s9 = sadd.s32 (%p2600_p3), %s2489_s29, %s2074_s22  ;;  %s3140_s0 = sld [smem:[#allocation11_spill]] (%p2600_p3) }
  0x1f   : > { %s2075_s10 = sshll.u32 (%p2600_p3), %s279_s9, 2  ;;  %s277_s18 = scalar_lea.vmem (%p2600_p3), [#allocation2], %s2073_s23 }
  0x24   : > { %s281_s17 = scalar_lea.vmem %s3140_s0, %s2075_s10 }
  0x25   : > { %v297_v0 = vld [vmem:[%s281_s17] sm:$0xf]  ;;  %v299_v1 = vld [vmem:[%s281_s17 + $0x8] sm:$0xf]  ;;  %v301_v2 = vld [vmem:[%s281_s17 + $0x10] sm:$0xf] }
  0x26   : > { %298 = vst [vmem:[%s277_s18] sm:$0xf] %v297_v0  ;;  %300 = vst [vmem:[%s277_s18 + $0x4] sm:$0xf] %v299_v1  ;;  %v303_v3 = vld [vmem:[%s281_s17 + $0x18] sm:$0xf] }
  0x27   : > { %302 = vst [vmem:[%s277_s18 + $0x8] sm:$0xf] %v301_v2  ;;  %304 = vst [vmem:[%s277_s18 + $0xc] sm:$0xf] %v303_v3 }
  0x28 PF: > { %343 = sbr.rel (!%p2600_p3) target bundleno = 48 (0x30), region = 65  ;;  %s345_s19 = sand.u32 (%p2600_p3), 1, %s2477_s26  }
  0x29   : > { %s2077_s21 = sshll.u32 (%p2600_p3), %s2493_s30, 3  ;;  %s2076_s12 = sshll.u32 (%p2600_p3), %s345_s19, 4 }
  0x2a   : > { %s349_s22 = sadd.s32 (%p2600_p3), %s2489_s29, %s2077_s21  ;;  %s347_s17 = scalar_lea.vmem (%p2600_p3), [#allocation3], %s2076_s12 }
  0x2b   : > { %s2078_s9 = sshll.u32 (%p2600_p3), %s349_s22, 2 }
  0x2c   : > { %s351_s23 = scalar_lea.vmem (%p2600_p3), %s3126_s2, %s2078_s9 }
  0x2d   : > { %v367_v4 = vld [vmem:[%s351_s23] sm:$0xf] (%p2600_p3)  ;;  %v369_v5 = vld [vmem:[%s351_s23 + $0x8] sm:$0xf] (%p2600_p3)  ;;  %v371_v6 = vld [vmem:[%s351_s23 + $0x10] sm:$0xf] (%p2600_p3) }
  0x2e   : > { %368 = vst [vmem:[%s347_s17] sm:$0xf] (%p2600_p3), %v367_v4  ;;  %370 = vst [vmem:[%s347_s17 + $0x4] sm:$0xf] (%p2600_p3), %v369_v5  ;;  %v373_v7 = vld [vmem:[%s351_s23 + $0x18] sm:$0xf] (%p2600_p3) }
  0x2f   : > { %372 = vst [vmem:[%s347_s17 + $0x8] sm:$0xf] %v371_v6  ;;  %374 = vst [vmem:[%s347_s17 + $0xc] sm:$0xf] %v373_v7 }
  0x30 PF: > { %p2079_p12 = scmp.ge.s32.totalorder %s2497_s8, 1  ;;  %p436_p13 = scmp.lt.s32.totalorder %s2497_s8, 5 }
  0x32   : > { %p437_p0 = pnand %p2079_p12, %p436_p13 }
  0x33   : > { %p517_p1 = scmp.lt.s32.totalorder (!%p437_p0), %s2485_s28, 1  ;;  %v2499_v8 = vmov (!%p437_p0), 0.0   ;;  %vm2500_vm0 = vmmov (!%p437_p0), 0   ;;  %s2653_s19 = sand.u32 (!%p437_p0), 1, %s2473_s25   ;;  %vm575_vm1 = vcmask (!%p437_p0), 1042432   ;;  %vm571_vm2 = vcmask (!%p437_p0), 179200  }
  0x34   : > { %440 = sbr.rel (%p437_p0) target bundleno = 1488 (0x5d0), region = 118  ;;  %2190 = vmatprep.subr.bf16.mxu1 (!%p437_p0), %v2499_v8  ;;  %2206 = vmatprep.subr.bf16.mxu0 (!%p437_p0), %v2499_v8  ;;  %s2080_s9 = sshll.u32 (!%p437_p0), %s2653_s19, 4  ;;  %vm619_vm3 = vcmask (!%p437_p0), 130048   ;;  %v2501_v32 = vmov (!%p437_p0), 0   ;;  %v2502_v57 = vmov (!%p437_p0), 1966171168   ;;  %v703_v59 = vlaneseq (!%p437_p0) }
  0x35   : > { %2194 = vmatprep.mubr.msk.bf16.mxu1 (!%p437_p0), %vm2500_vm0, %v2499_v8  ;;  %2210 = vmatprep.mubr.msk.bf16.mxu0 (!%p437_p0), %vm2500_vm0, %v2499_v8  ;;  %s2671_s10 = scalar_lea.vmem (!%p437_p0), [#allocation2], %s2080_s9  ;;  %s2683_s13 = scalar_lea.vmem (!%p437_p0), [#allocation3], %s2080_s9  ;;  %v701_v58 = vunpack.c.l.s4 (!%p437_p0), %v2502_v57  ;;  %vm1670_vm6 = vcmask (!%p437_p0), 1041409   ;;  %vm1672_vm7 = vcmask (!%p437_p0), 1042434   ;;  %vm1674_vm8 = vcmask (!%p437_p0), 1043459  }
  0x36   : > { %v556_v15 = vld [vmem:[%s2671_s10] sm:$0xf] (!%p437_p0)  ;;  %v2097_v16 = vld [vmem:[%s2671_s10 + $0x4] sm:$0xf] (!%p437_p0)  ;;  %p539_p2 = scmp.lt.s32.totalorder (!%p437_p0), %s2481_s27, 1  ;;  %2338 = vset.pattern.permute.xlu0 (!%p437_p0), %v2501_v32  ;;  %v2725_v1 = vshrl.u32 (!%p437_p0), %v703_v59, 7 }
  0x37   : > { %v560_v17 = vld [vmem:[%s2683_s13] sm:$0xff] (!%p437_p0)   ;;  %v702_v0 = vunpack.c.0.s8 (!%p437_p0), %v701_v58  ;;  %vm1676_vm9 = vcmask (!%p437_p0), 1044484   ;;  %vm1678_vm10 = vcmask (!%p437_p0), 1045509   ;;  %vm1680_vm11 = vcmask (!%p437_p0), 1046534  }
  0x38   : > { %v561_v18 = vunpack.c.l.bf16 (!%p437_p0), %v560_v17  ;;  %v836_v19 = vunpack.c.h.bf16 (!%p437_p0), %v560_v17  ;;  %vm1682_vm12 = vcmask (!%p437_p0), 1047559   ;;  %vm1832_vm13 = vcmask (!%p437_p0), 64512  }
  0x39   : > { %v2740_v7 = vsub.s32 (!%p437_p0), %v702_v0, %v2725_v1  ;;  %vm1835_vm14 = vcmask (!%p437_p0), 195584   ;;  %vm1837_vm15 = vcmask (!%p437_p0), 261120  }
  0x3b   : > { %s2645_s14 = scalar_select %p517_p1, %s2485_s28, 1 }
  0x3c   : > { %s540_s17 = scalar_select %p539_p2, %s2481_s27, 1 }
  0x3d   : > { %s3133_s18 = smul.u32 48, %s2645_s14  ;;  %s2089_s23 = sshll.u32 %s2645_s14, 1 }
  0x3e   : > { %s542_s21 = sadd.s32 %s2089_s23, %s540_s17 }
  0x3f   : > { %s2660_s22 = scalar_lea.vmem %s3125_s1, %s3133_s18  ;;  %s2090_s12 = sshll.u32 %s542_s21, 3 }
  0x40   : > { %v2339_v9 = vld [vmem:[%s2660_s22] sm:$0xff]   ;;  %v2340_v10 = vld [vmem:[%s2660_s22 + $0xc] sm:$0xff]   ;;  %v2341_v11 = vld [vmem:[%s2660_s22 + $0x8] ss:$0 sps:$4 sm:$0x77]   ;;  %s544_s0 = scalar_lea.vmem %s3129_s5, %s2090_s12  ;;  %s2086_s21 = sshll.u32 %s2481_s27, 3 }
  0x41   : > { %2191 = vmatpush3.bf16.msra.mxu1 %v2339_v9  ;;  %2207 = vmatpush3.bf16.msra.mxu0 %v2340_v10  ;;  %v2342_v12 = vld [vmem:[%s2660_s22 + $0x14] ss:$0 sps:$4 sm:$0x77]   ;;  %v577_v13 = vsel %vm575_vm1, %v2341_v11, 0  ;;  %v546_v33 = vld [vmem:[%s544_s0] sm:$0xff]  ;;  %s3141_s0 = smul.u32 48, %s2645_s14 }
  0x42   : > { %2192 = vmatprep.subr.bf16.mxu1 %v2499_v8  ;;  %2208 = vmatprep.subr.bf16.mxu0 %v2499_v8  ;;  %v850_v14 = vsel %vm575_vm1, %v2342_v12, 0  ;;  %vm547_vm4 = vcmp.gt.f32.partialorder %v546_v33, 0.5  ;;  %p530_p3 = scmp.lt.s32.totalorder %s2086_s21, 15  ;;  %v2347_v62 = vld [vmem:[%s2660_s22 + $0x18] sm:$0xff]   ;;  %s2087_s12 = sshll.u32 %s2645_s14, 4  ;;  %v2349_v6 = vld [vmem:[%s2660_s22 + $0x24] sm:$0xff]  }
  0x43   : > { %v631_v34 = vsel %vm547_vm4, 1, %v2501_v32  ;;  %s2701_s17 = scalar_lea.vmem %s3127_s3, %s3141_s0  ;;  %v2348_v3 = vld [vmem:[%s2660_s22 + $0x20] ss:$0 sps:$4 sm:$0x77]  }
  0x44   : > { %v2343_v45 = vld [vmem:[%s2701_s17] sm:$0xff]   ;;  %v2344_v47 = vld [vmem:[%s2701_s17 + $0xc] sm:$0xff]   ;;  %v2345_v49 = vld [vmem:[%s2701_s17 + $0x8] ss:$0 sps:$4 sm:$0x33]   ;;  %s3158_s21 = smov (!%p530_p3, %s2086_s21), 15 }
  0x45   : > { %2193 = vmatpush3.bf16.msra.mxu1 %v577_v13  ;;  %2209 = vmatpush3.bf16.msra.mxu0 %v850_v14  ;;  %v653_v46 = vsel %vm619_vm3, %v2343_v45, 0  ;;  %v921_v48 = vsel %vm619_vm3, %v2344_v47, 0  ;;  %v656_v50 = vsel %vm619_vm3, %v2345_v49, 0  ;;  %v2346_v51 = vld [vmem:[%s2701_s17 + $0x14] ss:$0 sps:$4 sm:$0x33]   ;;  %s533_s14 = sadd.s32 %s2087_s12, %s3158_s21 }
  0x46   : > { %2198 = vmatprep.subr.bf16.mxu1 %v2499_v8  ;;  %2214 = vmatprep.subr.bf16.mxu0 %v2499_v8  ;;  %v924_v52 = vsel %vm619_vm3, %v2346_v51, 0  ;;  %v1110_v11 = vsel %vm575_vm1, %v2348_v3, 0  ;;  %v2350_v12 = vld [vmem:[%s2660_s22 + $0x2c] ss:$0 sps:$4 sm:$0x77]   ;;  %s2088_s9 = sshll.u32 %s533_s14, 2 }
  0x47   : > { %v2111_v14 = vld [vmem:[%s2671_s10 + $0x8] sm:$0xf]  ;;  %s2764_s18 = scalar_lea.vmem %s3128_s4, %s2088_s9 }
  0x48   : > { %2195 = vmatmul.mubr.msk.bf16.vlgmr.msra.gmra.mrb[0].mxu1 %vm571_vm2, %v556_v15  ;;  %2211 = vmatmul.mubr.msk.bf16.vlgmr.msra.gmra.mrb[0].mxu0 %vm571_vm2, %v2097_v16  ;;  %v1370_v15 = vsel %vm575_vm1, %v2350_v12, 0 }
  0x49   : > { %2202 = vmatprep.mubr.msk.bf16.mxu1 %vm2500_vm0, %v2499_v8  ;;  %2218 = vmatprep.mubr.msk.bf16.mxu0 %vm2500_vm0, %v2499_v8 }
  0x4e   : > { %2199 = vmatpush3.bf16.xpose.msra.mxu1 %v653_v46  ;;  %2215 = vmatpush3.bf16.xpose.msra.mxu0 %v921_v48 }
  0x4f   : > { %2200 = vmatprep.subr.bf16.mxu1 %v2499_v8  ;;  %2216 = vmatprep.subr.bf16.mxu0 %v2499_v8 }
  0x56   : > { %2201 = vmatpush3.bf16.xpose.msra.mxu1 %v656_v50  ;;  %2217 = vmatpush3.bf16.xpose.msra.mxu0 %v924_v52 }
  0x57   : > { %2222 = vmatprep.subr.bf16.mxu1 %v2499_v8  ;;  %2238 = vmatprep.subr.bf16.mxu0 %v2499_v8 }
 0x11b   : > { %v613_v20 = vpop.f32.mrb[0].mxu1  ;;  %v886_v23 = vpop.f32.mrb[0].mxu0 }
 0x11c   : > { %v614_v21 = vadd.f32 %v613_v20, %v561_v18  ;;  %v2196_v22 = vpop.f32.mrb[1].mxu1  ;;  %v887_v24 = vadd.f32 %v886_v23, %v836_v19  ;;  %v2212_v26 = vpop.f32.mrb[1].mxu0  ;;  %v2767_v18 = vsub.s32 0, %v2725_v1  ;;  %v2165_v23 = vld [vmem:[%s2764_s18 + $0x18] sm:$0xff]  }
 0x11d   : > { %v616_v25 = vpop.f32.mrb[2].mxu1  ;;  %v889_v28 = vpop.f32.mrb[2].mxu0  ;;  %v2774_v22 = vld [vmem:[%s2764_s18 + $0x10] sm:$0xff]   ;;  %v2794_v33 = vunpack.c.h.bf16 %v2165_v23 }
 0x11e   : > { %v2197_v27 = vpop.f32.mrb[3].mxu1  ;;  %v620_v29 = vsel %vm619_vm3, %v614_v21, -inf  ;;  %v2213_v30 = vpop.f32.mrb[3].mxu0  ;;  %v892_v31 = vsel %vm619_vm3, %v887_v24, -inf }
 0x11f   : > { %621 = vmax.xlane.f32.xlu0 %v620_v29  ;;  %v2787_v29 = vunpack.c.l.bf16 %v2165_v23 }
 0x123   : > { %893 = vmax.xlane.f32.xlu0 %v892_v31 }
 0x139   : > { %633 = vperm.xlu0 %2338, %v631_v34  }
 0x1ac   : > { %v622_v35 = vpop.xlane.xlu0 %621 }
 0x1ad   : > { %v623_v36 = vsub.f32 %v614_v21, %v622_v35  ;;  %v2125_v21 = vld [vmem:[%s2671_s10 + $0xc] sm:$0xf]  ;;  %s2503_s10 = smov 20  }
 0x1af   : > { %v624_v37 = vmul.f32 1.442695, %v623_v36 }
 0x1b0   : > { %v894_v38 = vpop.xlane.xlu0 %893 }
 0x1b1   : > { %2355 = vpow2.f32 %v624_v37  ;;  %v895_v39 = vsub.f32 %v887_v24, %v894_v38  ;;  %v2780_v24 = vunpack.c.h.bf16 %v2774_v22 }
 0x1b3   : > { %v896_v40 = vmul.f32 1.442695, %v895_v39 }
 0x1b5   : > { %2357 = vpow2.f32 %v896_v40  ;;  %v2115_v40 = vld [vmem:[%s2683_s13 + $0x8] sm:$0xff]   ;;  %s2082_s13 = sshll.u32 %s2653_s19, 3 }
 0x1b6   : > { %v1356_v50 = vunpack.c.h.bf16 %v2115_v40  ;;  %s516_s23 = scalar_lea.vmem [#allocation6], %s2082_s13 }
 0x1b7   : > { %s1875_s0 = sshll.u32 %s516_s23, 4  ;;  %s1876_s0 = int_to_ptr.vmem [resolvable:$true] %s1875_s0 }
 0x1b8   : > { %v2715_v55 = vpop.permute.xlu0 %633 }
 0x1b9   : > { %vm635_vm5 = vcmp.eq.s32.totalorder %v2715_v55, 1 }
 0x1bb   : > { %v2356_v41 = vpop.eup %2355 }
 0x1bc   : > { %v626_v42 = vsel %vm619_vm3, %v2356_v41, 0.0 }
 0x1bd   : > { %627 = vadd.xlane.f32.xlu1 %v626_v42 }
 0x1bf   : > { %v2358_v43 = vpop.eup %2357 }
 0x1c0   : > { %v898_v44 = vsel %vm619_vm3, %v2358_v43, 0.0 }
 0x1c1   : > { %899 = vadd.xlane.f32.xlu1 %v898_v44  ;;  %v1096_v44 = vunpack.c.l.bf16 %v2115_v40 }
 0x24a   : > { %v628_v53 = vpop.xlane.xlu1 %627 }
 0x24b   : > { %2359 = vrcp.f32 %v628_v53 }
 0x24e   : > { %v900_v54 = vpop.xlane.xlu1 %899 }
 0x24f   : > { %2361 = vrcp.f32 %v900_v54 }
 0x255   : > { %v2360_v56 = vpop.eup %2359 }
 0x256   : > { %v630_v60 = vmul.f32 %v2360_v56, %v2356_v41 }
 0x258   : > { %v2721_v61 = vsel %vm635_vm5, %v630_v60, 0.0 }
 0x259   : > { %v2362_v63 = vpop.eup %2361  ;;  %v637_v2 = vpack.c.bf16 %v2721_v61, %v2721_v61 }
 0x25a   : > { %v902_v4 = vmul.f32 %v2362_v63, %v2358_v43 }
 0x25b   : > { %2203 = vmatmul.mubr.msk.bf16.vlgmr.msra.gmra.mrb[4].mxu1 %vm619_vm3, %v637_v2 }
 0x25c   : > { %v2734_v5 = vsel %vm635_vm5, %v902_v4, 0.0  ;;  %2223 = vmatpush3.bf16.msra.mxu1 %v2347_v62  ;;  %2226 = vmatprep.mubr.msk.bf16.mxu1 %vm2500_vm0, %v2499_v8 }
 0x25d   : > { %v904_v9 = vpack.c.bf16 %v2734_v5, %v2734_v5  ;;  %v967_v10 = vcombine.high %v2734_v5, %v2734_v5  ;;  %2224 = vmatprep.subr.bf16.mxu1 %v2499_v8 }
 0x25f   : > { %v981_v13 = vrot.slane %v967_v10, %v2740_v7  ;;  %2219 = vmatmul.mubr.msk.bf16.vlgmr.msra.gmra.mrb[4].mxu0 %vm619_vm3, %v904_v9 }
 0x260   : > { %2225 = vmatpush3.bf16.msra.mxu1 %v1110_v11  ;;  %2239 = vmatpush3.bf16.msra.mxu0 %v2349_v6  ;;  %v706_v6 = vrot.slane %v2721_v61, %v2740_v7  ;;  %v2148_v11 = vld [vmem:[%s2764_s18] sm:$0xff]  }
 0x261   : > { %2240 = vmatprep.subr.bf16.mxu0 %v2499_v8  ;;  %2242 = vmatprep.mubr.msk.bf16.mxu0 %vm2500_vm0, %v2499_v8  ;;  %v983_v16 = vcombine.high %v981_v13, %v981_v13  ;;  %v2757_v17 = vrot.slane %v981_v13, %v2740_v7 }
 0x262   : > { %2230 = vmatprep.subr.bf16.mxu1 %v2499_v8  ;;  %v722_v10 = vrot.slane %v706_v6, %v2740_v7  ;;  %v714_v12 = vcombine.high %v706_v6, %v706_v6 }
 0x263   : > { %2227 = vmatmul.mubr.msk.bf16.vlgmr.msra.gmra.mrb[8].mxu1 %vm571_vm2, %v2111_v14  ;;  %v1011_v19 = vrot.slane %v983_v16, %v2740_v7  ;;  %v1013_v20 = vcombine.high %v2757_v17, %v2757_v17  ;;  %v2812_v14 = vunpack.c.l.bf16 %v2148_v11  ;;  %v974_v16 = vrot.slane %v2734_v5, %v2740_v7 }
 0x264   : > { %2241 = vmatpush3.bf16.msra.mxu0 %v1370_v15  ;;  %2234 = vmatprep.mubr.msk.bf16.mxu1 %vm2500_vm0, %v2499_v8  ;;  %v759_v15 = vrot.slane %v722_v10, %v2767_v18  ;;  %v744_v40 = vcombine.high %v722_v10, %v722_v10 }
 0x265   : > { %v1039_v25 = vrot.slane %v1011_v19, %v2767_v18  ;;  %v1043_v26 = vrot.slane %v1013_v20, %v2767_v18  ;;  %v1015_v27 = vcombine.high %v1011_v19, %v1011_v19  ;;  %2246 = vmatprep.subr.bf16.mxu0 %v2499_v8  ;;  %v736_v20 = vrot.slane %v714_v12, %v2740_v7 }
 0x266   : > { %v796_v23 = vmul.f32 %v2812_v14, %v759_v15  ;;  %v990_v5 = vrot.slane %v974_v16, %v2740_v7  ;;  %v2353_v15 = vld [vmem:[%s2701_s17 + $0x20] ss:$0 sps:$4 sm:$0x33]  }
 0x267   : > { %2243 = vmatmul.mubr.msk.bf16.vlgmr.msra.gmra.mrb[8].mxu0 %vm571_vm2, %v2125_v21  ;;  %v1061_v28 = vmul.f32 %v2780_v24, %v1039_v25  ;;  %v1062_v31 = vmul.f32 %v2787_v29, %v1043_v26  ;;  %v1047_v32 = vrot.slane %v1015_v27, %v2767_v18  ;;  %v2823_v25 = vunpack.c.h.bf16 %v2148_v11 }
 0x268   : > { %2250 = vmatprep.mubr.msk.bf16.mxu0 %vm2500_vm0, %v2499_v8  ;;  %v763_v27 = vrot.slane %v736_v20, %v2767_v18 }
 0x269   : > { %v1079_v30 = vsel %vm619_vm3, %v1061_v28, 0.0  ;;  %v1082_v34 = vsel %vm619_vm3, %v1062_v31, 0.0  ;;  %v1063_v35 = vmul.f32 %v2794_v33, %v1047_v32  ;;  %v982_v28 = vcombine.high %v974_v16, %v974_v16  ;;  %v2354_v16 = vld [vmem:[%s2701_s17 + $0x2c] ss:$0 sps:$4 sm:$0x33]  }
 0x26a   : > { %1080 = vadd.xlane.f32.xlu0 %v1079_v30  ;;  %v804_v30 = vsel %vm619_vm3, %v796_v23, 0.0  ;;  %v797_v31 = vmul.f32 %v2823_v25, %v763_v27  ;;  %v1019_v32 = vrot.slane %v990_v5, %v2767_v18  ;;  %v1035_v23 = vrot.slane %v2757_v17, %v2767_v18 }
 0x26b   : > { %v1085_v36 = vsel %vm619_vm3, %v1063_v35, 0.0  ;;  %v1444_v27 = vsel %vm619_vm3, %v2354_v16, 0 }
 0x26c   : > { %v807_v35 = vsel %vm619_vm3, %v797_v31, 0.0 }
 0x26e   : > { %1083 = vadd.xlane.f32.xlu0 %v1082_v34  ;;  %v1004_v34 = vrot.slane %v982_v28, %v2740_v7 }
 0x272   : > { %1086 = vadd.xlane.f32.xlu0 %v1085_v36  ;;  %v1056_v36 = vmul.f32 %v2812_v14, %v1019_v32 }
 0x32e   : > { %v2799_v37 = vpop.f32.mrb[4].mxu1 }
 0x32f   : > { %v2204_v38 = vpop.f32.mrb[5].mxu1 }
 0x330   : > { %v695_v39 = vpop.f32.mrb[6].mxu1  ;;  %v1023_v38 = vrot.slane %v1004_v34, %v2767_v18 }
 0x331   : > { %v2205_v41 = vpop.f32.mrb[7].mxu1  ;;  %v2163_v39 = vld [vmem:[%s2764_s18 + $0x8] sm:$0xff]   ;;  %s1845_s18 = scalar_lea.sflag [#allocation7], %s2653_s19 }
 0x332   : > { %v2802_v42 = vpop.f32.mrb[4].mxu0  ;;  %v2837_v41 = vunpack.c.l.bf16 %v2163_v39 }
 0x333   : > { %v2220_v43 = vpop.f32.mrb[5].mxu0 }
 0x334   : > { %v963_v45 = vpop.f32.mrb[6].mxu0  ;;  %v1064_v43 = vsel %vm619_vm3, %v1056_v36, 0.0 }
 0x335   : > { %v2221_v46 = vpop.f32.mrb[7].mxu0  ;;  %v767_v45 = vrot.slane %v744_v40, %v2767_v18 }
 0x336   : > { %v1146_v47 = vpop.f32.mrb[8].mxu1  ;;  %v1012_v46 = vcombine.high %v990_v5, %v990_v5 }
 0x337   : > { %v1147_v48 = vadd.f32 %v1146_v47, %v1096_v44  ;;  %v2228_v49 = vpop.f32.mrb[9].mxu1  ;;  %v1057_v44 = vmul.f32 %v2823_v25, %v1023_v38  ;;  %v699_v47 = vcombine.high %v2721_v61, %v2721_v61  ;;  %v1014_v61 = vcombine.high %v1004_v34, %v1004_v34 }
 0x338   : > { %v1149_v51 = vpop.f32.mrb[10].mxu1  ;;  %v798_v49 = vmul.f32 %v2837_v41, %v767_v45  ;;  %v2891_v45 = vand.u32 127, %v703_v59 }
 0x339   : > { %v2229_v52 = vpop.f32.mrb[11].mxu1  ;;  %v1152_v53 = vsel %vm619_vm3, %v1147_v48, -inf  ;;  %v746_v51 = vcombine.high %v736_v20, %v736_v20 }
 0x33a   : > { %v1406_v54 = vpop.f32.mrb[8].mxu0  ;;  %1153 = vmax.xlane.f32.xlu1 %v1152_v53  ;;  %v2847_v52 = vunpack.c.h.bf16 %v2163_v39  ;;  %v713_v53 = vrot.slane %v699_v47, %v2740_v7  ;;  %v2895_v47 = vsub.s32 %v2891_v45, %v2725_v1 }
 0x33b   : > { %v1407_v56 = vadd.f32 %v1406_v54, %v1356_v50  ;;  %v2244_v57 = vpop.f32.mrb[9].mxu0  ;;  %v1027_v50 = vrot.slane %v1012_v46, %v2767_v18  ;;  %v810_v54 = vsel %vm619_vm3, %v798_v49, 0.0 }
 0x33c   : > { %v1409_v58 = vpop.f32.mrb[10].mxu0  ;;  %v771_v57 = vrot.slane %v746_v51, %v2767_v18  ;;  %v715_v12 = vcombine.high %v713_v53, %v713_v53  ;;  %v1693_v51 = vadd.s32 4294967288, %v2891_v45 }
 0x33d   : > { %v2245_v60 = vpop.f32.mrb[11].mxu0  ;;  %v1412_v62 = vsel %vm619_vm3, %v1407_v56, -inf  ;;  %v2351_v58 = vld [vmem:[%s2701_s17 + $0x18] sm:$0xff]  }
 0x33e   : > { %1413 = vmax.xlane.f32.xlu1 %v1412_v62  ;;  %v1181_v60 = vsel %vm619_vm3, %v2351_v58, 0 }
 0x33f   : > { %2231 = vmatpush3.bf16.xpose.msra.mxu1 %v1181_v60 }
 0x340   : > { %2232 = vmatprep.subr.bf16.mxu1 %v2499_v8 }
 0x3c7   : > { %v1154_v63 = vpop.xlane.xlu1 %1153 }
 0x3c8   : > { %v1155_v0 = vsub.f32 %v1147_v48, %v1154_v63  ;;  %v1067_v48 = vsel %vm619_vm3, %v1057_v44, 0.0  ;;  %v799_v63 = vmul.f32 %v2847_v52, %v771_v57 }
 0x3ca   : > { %v1156_v2 = vmul.f32 1.442695, %v1155_v0  ;;  %v1031_v0 = vrot.slane %v1014_v61, %v2767_v18  ;;  %v2904_v61 = vsub.s32 %v1693_v51, %v2725_v1 }
 0x3cb   : > { %v1414_v3 = vpop.xlane.xlu1 %1413 }
 0x3cc   : > { %2363 = vpow2.f32 %v1156_v2  ;;  %v1415_v4 = vsub.f32 %v1407_v56, %v1414_v3  ;;  %v1058_v56 = vmul.f32 %v2837_v41, %v1027_v50  ;;  %v729_v2 = vrot.slane %v713_v53, %v2740_v7  ;;  %v2352_v3 = vld [vmem:[%s2701_s17 + $0x24] sm:$0xff]   ;;  %s2141_s17 = sshll.u32 %s2485_s28, 1  ;;  %s2504_s28 = smov [#allocation6]  }
 0x3cd   : > { %v1441_v6 = vsel %vm619_vm3, %v2352_v3, 0  ;;  %v1059_v10 = vmul.f32 %v2847_v52, %v1031_v0  ;;  %s3034_s21 = sadd.s32 %s2481_s27, %s2141_s17  ;;  %s2375_s27 = sshll.u32 %s2504_s28, 4  ;;  %s2376_s27 = int_to_ptr.vmem [resolvable:$false] %s2375_s27 }
 0x3ce   : > { %v1416_v9 = vmul.f32 1.442695, %v1415_v4  ;;  %v1070_v62 = vsel %vm619_vm3, %v1058_v56, 0.0  ;;  %v2862_v4 = vunpack.c.l.bf16 %v2774_v22  ;;  %v775_v11 = vrot.slane %v729_v2, %v2767_v18  ;;  %2247 = vmatpush3.bf16.xpose.msra.mxu0 %v1441_v6  ;;  %s3134_s12 = sshll.u32 %s3034_s21, 7  ;;  %s2377_s17 = scalar_lea.vmem %s2376_s27, 256 }
 0x3cf   : > { %2248 = vmatprep.subr.bf16.mxu0 %v2499_v8  ;;  %v1073_v22 = vsel %vm619_vm3, %v1059_v10, 0.0  ;;  %s3042_s22 = scalar_lea.hbm %s3131_s7, %s3134_s12  ;;  %p2378_p7 = scmp.lt.s32.totalorder %s1876_s0, %s2376_s27 }
 0x3d0   : > { %2365 = vpow2.f32 %v1416_v9  ;;  %v813_v9 = vsel %vm619_vm3, %v799_v63, 0.0  ;;  %v800_v20 = vmul.f32 %v2862_v4, %v775_v11  ;;  %v1060_v8 = vmul.f32 %v2862_v4, %v1035_v23 }
 0x3d2   : > { %v816_v5 = vsel %vm619_vm3, %v800_v20, 0.0  ;;  %v1076_v31 = vsel %vm619_vm3, %v1060_v8, 0.0 }
 0x3d6   : > { %v2810_v13 = vpop.eup %2363  ;;  %2249 = vmatpush3.bf16.xpose.msra.mxu0 %v1444_v27 }
 0x3d7   : > { %v1158_v19 = vsel %vm619_vm3, %v2810_v13, 0.0 }
 0x3d8   : > { %1159 = vadd.xlane.f32.xlu1 %v1158_v19  ;;  %v1184_v19 = vsel %vm619_vm3, %v2353_v15, 0 }
 0x3d9   : > { %2233 = vmatpush3.bf16.xpose.msra.mxu1 %v1184_v19 }
 0x3da   : > { %v2820_v21 = vpop.eup %2365 }
 0x3db   : > { %v1418_v26 = vsel %vm619_vm3, %v2820_v21, 0.0 }
 0x3dc   : > { %1419 = vadd.xlane.f32.xlu1 %v1418_v26  ;;  %v743_v26 = vrot.slane %v715_v12, %v2740_v7 }
 0x3de   : > { %v779_v28 = vrot.slane %v743_v26, %v2767_v18  ;;  %v747_v34 = vcombine.high %v743_v26, %v743_v26 }
 0x3e0   : > { %805 = vadd.xlane.f32.xlu1 %v804_v30  ;;  %v745_v30 = vcombine.high %v729_v2, %v729_v2  ;;  %v801_v32 = vmul.f32 %v2780_v24, %v779_v28  ;;  %v787_v38 = vrot.slane %v747_v34, %v2767_v18 }
 0x3e2   : > { %v783_v17 = vrot.slane %v745_v30, %v2767_v18  ;;  %v803_v40 = vmul.f32 %v2794_v33, %v787_v38 }
 0x3e4   : > { %808 = vadd.xlane.f32.xlu1 %v807_v35  ;;  %v819_v35 = vsel %vm619_vm3, %v801_v32, 0.0  ;;  %v802_v36 = vmul.f32 %v2787_v29, %v783_v17 }
 0x3e6   : > { %v822_v39 = vsel %vm619_vm3, %v802_v36, 0.0 }
 0x3e8   : > { %1065 = vadd.xlane.f32.xlu1 %v1064_v43  ;;  %v825_v43 = vsel %vm619_vm3, %v803_v40, 0.0 }
 0x3ec   : > { %1068 = vadd.xlane.f32.xlu1 %v1067_v48 }
 0x3f0   : > { %811 = vadd.xlane.f32.xlu1 %v810_v54 }
 0x3f4   : > { %1071 = vadd.xlane.f32.xlu1 %v1070_v62 }
 0x3f8   : > { %814 = vadd.xlane.f32.xlu1 %v813_v9 }
 0x3fc   : > { %1074 = vadd.xlane.f32.xlu1 %v1073_v22 }
 0x400   : > { %817 = vadd.xlane.f32.xlu1 %v816_v5 }
 0x404   : > { %1077 = vadd.xlane.f32.xlu1 %v1076_v31 }
 0x408   : > { %820 = vadd.xlane.f32.xlu1 %v819_v35 }
 0x40c   : > { %823 = vadd.xlane.f32.xlu1 %v822_v39 }
 0x410   : > { %826 = vadd.xlane.f32.xlu1 %v825_v43 }
 0x465   : > { %v1160_v44 = vpop.xlane.xlu1 %1159 }
 0x466   : > { %2367 = vrcp.f32 %v1160_v44 }
 0x469   : > { %v1420_v46 = vpop.xlane.xlu1 %1419 }
 0x46a   : > { %2369 = vrcp.f32 %v1420_v46 }
 0x46d   : > { %v806_v48 = vpop.xlane.xlu1 %805 }
 0x46e   : > { %v1641_v49 = vrot.slane %v806_v48, %v2895_v47 }
 0x470   : > { %v2368_v50 = vpop.eup %2367 }
 0x471   : > { %v1162_v53 = vmul.f32 %v2368_v50, %v2810_v13  ;;  %v809_v54 = vpop.xlane.xlu1 %808 }
 0x472   : > { %v1645_v56 = vrot.slane %v809_v54, %v2895_v47 }
 0x473   : > { %v1163_v59 = vsel %vm635_vm5, %v1162_v53, 0.0 }
 0x474   : > { %v2370_v57 = vpop.eup %2369  ;;  %v1671_v58 = vsel %vm1670_vm6, %v1645_v56, %v1641_v49  ;;  %v1164_v60 = vpack.c.bf16 %v1163_v59, %v1163_v59  ;;  %v1234_v62 = vrot.slane %v1163_v59, %v2740_v7  ;;  %v1227_v13 = vcombine.high %v1163_v59, %v1163_v59 }
 0x475   : > { %v1422_v63 = vmul.f32 %v2370_v57, %v2820_v21  ;;  %v1066_v0 = vpop.xlane.xlu1 %1065 }
 0x476   : > { %v1697_v2 = vrot.slane %v1066_v0, %v2904_v61  ;;  %2235 = vmatmul.mubr.msk.bf16.vlgmr.msra.gmra.mrb[12].mxu1 %vm619_vm3, %v1164_v60  ;;  %v1250_v3 = vrot.slane %v1234_v62, %v2740_v7  ;;  %v1242_v6 = vcombine.high %v1234_v62, %v1234_v62  ;;  %v1241_v22 = vrot.slane %v1227_v13, %v2740_v7 }
 0x477   : > { %v1423_v9 = vsel %vm635_vm5, %v1422_v63, 0.0 }
 0x478   : > { %v1424_v10 = vpack.c.bf16 %v1423_v9, %v1423_v9  ;;  %v1279_v11 = vrot.slane %v1250_v3, %v2767_v18  ;;  %v2916_v12 = vrot.slane %v1242_v6, %v2740_v7  ;;  %v1494_v21 = vrot.slane %v1423_v9, %v2740_v7 }
 0x479   : > { %v1069_v15 = vpop.xlane.xlu1 %1068  ;;  %v1272_v16 = vcombine.high %v1250_v3, %v1250_v3  ;;  %v1487_v19 = vcombine.high %v1423_v9, %v1423_v9  ;;  %v1257_v43 = vrot.slane %v1241_v22, %v2740_v7  ;;  %v1243_v60 = vcombine.high %v1241_v22, %v1241_v22  ;;  %v1081_v9 = vpop.xlane.xlu0 %1080 }
 0x47a   : > { %v1701_v20 = vrot.slane %v1069_v15, %v2904_v61  ;;  %2251 = vmatmul.mubr.msk.bf16.vlgmr.msra.gmra.mrb[12].mxu0 %vm619_vm3, %v1424_v10  ;;  %v1316_v55 = vmul.f32 %v2812_v14, %v1279_v11  ;;  %v1283_v23 = vrot.slane %v2916_v12, %v2767_v18  ;;  %v1510_v26 = vrot.slane %v1494_v21, %v2740_v7 }
 0x47b   : > { %v1287_v27 = vrot.slane %v1272_v16, %v2767_v18  ;;  %v1501_v5 = vrot.slane %v1487_v19, %v2740_v7  ;;  %v1502_v8 = vcombine.high %v1494_v21, %v1494_v21  ;;  %v1295_v57 = vrot.slane %v1257_v43, %v2767_v18 }
 0x47c   : > { %v1726_v28 = vsel %vm1670_vm6, %v1701_v20, %v1697_v2  ;;  %v1324_v30 = vsel %vm619_vm3, %v1316_v55, 0.0  ;;  %v1317_v31 = vmul.f32 %v2823_v25, %v1283_v23  ;;  %v1539_v32 = vrot.slane %v1510_v26, %v2767_v18 }
 0x47d   : > { %1325 = vadd.xlane.f32.xlu1 %v1324_v30  ;;  %v812_v17 = vpop.xlane.xlu1 %811  ;;  %v1532_v34 = vcombine.high %v1510_v26, %v1510_v26  ;;  %v1517_v35 = vrot.slane %v1501_v5, %v2740_v7  ;;  %v1524_v36 = vrot.slane %v1502_v8, %v2740_v7  ;;  %v1318_v46 = vmul.f32 %v2837_v41, %v1287_v27  ;;  %v1084_v8 = vpop.xlane.xlu0 %1083 }
 0x47e   : > { %v1649_v38 = vrot.slane %v812_v17, %v2895_v47  ;;  %v1327_v39 = vsel %vm619_vm3, %v1317_v31, 0.0  ;;  %v1576_v40 = vmul.f32 %v2812_v14, %v1539_v32  ;;  %v1503_v56 = vcombine.high %v1501_v5, %v1501_v5 }
 0x47f   : > { %1328 = vadd.xlane.f32.xlu0 %v1327_v39  ;;  %v1547_v44 = vrot.slane %v1532_v34, %v2767_v18  ;;  %v1555_v48 = vrot.slane %v1517_v35, %v2767_v18  ;;  %v1543_v51 = vrot.slane %v1524_v36, %v2767_v18  ;;  %v1534_v53 = vcombine.high %v1524_v36, %v1524_v36 }
 0x480   : > { %v1673_v49 = vsel %vm1672_vm7, %v1649_v38, %v1671_v58  ;;  %v1584_v50 = vsel %vm619_vm3, %v1576_v40, 0.0  ;;  %v2951_v0 = vrot.slane %v1503_v56, %v2740_v7  ;;  %v1274_v3 = vcombine.high %v2916_v12, %v2916_v12 }
 0x481   : > { %1585 = vadd.xlane.f32.xlu1 %v1584_v50  ;;  %v1072_v54 = vpop.xlane.xlu1 %1071  ;;  %v1578_v14 = vmul.f32 %v2837_v41, %v1547_v44  ;;  %v1580_v63 = vmul.f32 %v2862_v4, %v1555_v48  ;;  %v1551_v58 = vrot.slane %v1534_v53, %v2767_v18  ;;  %v1330_v41 = vsel %vm619_vm3, %v1318_v46, 0.0  ;;  %v1087_v48 = vpop.xlane.xlu0 %1086 }
 0x482   : > { %v1705_v59 = vrot.slane %v1072_v54, %v2904_v61  ;;  %v1577_v2 = vmul.f32 %v2823_v25, %v1543_v51  ;;  %v1320_v11 = vmul.f32 %v2862_v4, %v1295_v57  ;;  %v1559_v16 = vrot.slane %v2951_v0, %v2767_v18 }
 0x483   : > { %v1590_v62 = vsel %vm619_vm3, %v1578_v14, 0.0  ;;  %v1596_v21 = vsel %vm619_vm3, %v1580_v63, 0.0  ;;  %v1579_v15 = vmul.f32 %v2847_v52, %v1551_v58  ;;  %v1533_v19 = vcombine.high %v1517_v35, %v1517_v35 }
 0x484   : > { %v1727_v13 = vsel %vm1672_vm7, %v1705_v59, %v1726_v28  ;;  %1591 = vadd.xlane.f32.xlu0 %v1590_v62  ;;  %v1587_v12 = vsel %vm619_vm3, %v1577_v2, 0.0  ;;  %v1291_v22 = vrot.slane %v1274_v3, %v2767_v18  ;;  %v1271_v20 = vrot.slane %v1243_v60, %v2740_v7 }
 0x485   : > { %1331 = vadd.xlane.f32.xlu1 %v1330_v41  ;;  %v815_v6 = vpop.xlane.xlu1 %814  ;;  %v1593_v23 = vsel %vm619_vm3, %v1579_v15, 0.0  ;;  %v1581_v26 = vmul.f32 %v2780_v24, %v1559_v16  ;;  %v1563_v27 = vrot.slane %v1533_v19, %v2767_v18  ;;  %v1273_v5 = vcombine.high %v1257_v43, %v1257_v43 }
 0x486   : > { %v1653_v10 = vrot.slane %v815_v6, %v2895_v47  ;;  %v1336_v30 = vsel %vm619_vm3, %v1320_v11, 0.0  ;;  %v1319_v31 = vmul.f32 %v2847_v52, %v1291_v22  ;;  %v1299_v7 = vrot.slane %v1271_v20, %v2767_v18 }
 0x487   : > { %v1599_v34 = vsel %vm619_vm3, %v1581_v26, 0.0  ;;  %v1582_v35 = vmul.f32 %v2787_v29, %v1563_v27  ;;  %v1303_v36 = vrot.slane %v1273_v5, %v2767_v18  ;;  %v1275_v40 = vcombine.high %v1271_v20, %v1271_v20 }
 0x488   : > { %v1675_v25 = vsel %vm1674_vm8, %v1653_v10, %v1673_v49  ;;  %1597 = vadd.xlane.f32.xlu0 %v1596_v21  ;;  %v1333_v39 = vsel %vm619_vm3, %v1319_v31, 0.0  ;;  %v1321_v52 = vmul.f32 %v2780_v24, %v1299_v7  ;;  %v1717_v44 = vrot.slane %v1081_v9, %v2904_v61 }
 0x489   : > { %1588 = vadd.xlane.f32.xlu1 %v1587_v12  ;;  %v1075_v55 = vpop.xlane.xlu1 %1074  ;;  %v1721_v46 = vrot.slane %v1084_v8, %v2904_v61  ;;  %v1602_v50 = vsel %vm619_vm3, %v1582_v35, 0.0  ;;  %v1535_v51 = vcombine.high %v2951_v0, %v2951_v0  ;;  %v1322_v54 = vmul.f32 %v2787_v29, %v1303_v36 }
 0x48a   : > { %v1709_v4 = vrot.slane %v1075_v55, %v2904_v61  ;;  %v1339_v53 = vsel %vm619_vm3, %v1321_v52, 0.0  ;;  %v1307_v14 = vrot.slane %v1275_v40, %v2767_v18  ;;  %v1725_v56 = vrot.slane %v1087_v48, %v2904_v61 }
 0x48b   : > { %v1342_v0 = vsel %vm619_vm3, %v1322_v54, 0.0  ;;  %v1742_v55 = vadd.s32 4294967280, %v2891_v45 }
 0x48c   : > { %v1728_v28 = vsel %vm1674_vm8, %v1709_v4, %v1727_v13  ;;  %1594 = vadd.xlane.f32.xlu0 %v1593_v23  ;;  %v1323_v29 = vmul.f32 %v2794_v33, %v1307_v14  ;;  %v1567_v13 = vrot.slane %v1535_v51, %v2767_v18 }
 0x48d   : > { %1337 = vadd.xlane.f32.xlu1 %v1336_v30  ;;  %v818_v32 = vpop.xlane.xlu1 %817  ;;  %v1745_v26 = vsub.s32 %v1742_v55, %v2725_v1 }
 0x48e   : > { %v1657_v17 = vrot.slane %v818_v32, %v2895_v47  ;;  %v1345_v3 = vsel %vm619_vm3, %v1323_v29, 0.0  ;;  %v1583_v6 = vmul.f32 %v2794_v33, %v1567_v13 }
 0x490   : > { %v1677_v38 = vsel %vm1676_vm9, %v1657_v17, %v1675_v25  ;;  %1600 = vadd.xlane.f32.xlu0 %v1599_v34  ;;  %v1605_v21 = vsel %vm619_vm3, %v1583_v6, 0.0 }
 0x491   : > { %1334 = vadd.xlane.f32.xlu1 %v1333_v39  ;;  %v1078_v43 = vpop.xlane.xlu1 %1077 }
 0x492   : > { %v1713_v49 = vrot.slane %v1078_v43, %v2904_v61 }
 0x494   : > { %v1729_v24 = vsel %vm1676_vm9, %v1713_v49, %v1728_v28  ;;  %1603 = vadd.xlane.f32.xlu0 %v1602_v50 }
 0x495   : > { %v1730_v59 = vsel %vm1678_vm10, %v1717_v44, %v1729_v24  ;;  %1340 = vadd.xlane.f32.xlu1 %v1339_v53  ;;  %v821_v57 = vpop.xlane.xlu1 %820 }
 0x496   : > { %v1661_v60 = vrot.slane %v821_v57, %v2895_v47  ;;  %v1731_v62 = vsel %vm1680_vm11, %v1721_v46, %v1730_v59 }
 0x497   : > { %v1732_v63 = vsel %vm1682_vm12, %v1725_v56, %v1731_v62 }
 0x498   : > { %v1679_v58 = vsel %vm1678_vm10, %v1661_v60, %v1677_v38 }
 0x499   : > { %1343 = vadd.xlane.f32.xlu1 %v1342_v0  ;;  %v824_v61 = vpop.xlane.xlu1 %823 }
 0x49a   : > { %v1665_v41 = vrot.slane %v824_v61, %v2895_v47 }
 0x49c   : > { %v1681_v2 = vsel %vm1680_vm11, %v1665_v41, %v1679_v58 }
 0x49d   : > { %1346 = vadd.xlane.f32.xlu1 %v1345_v3  ;;  %v827_v9 = vpop.xlane.xlu1 %826 }
 0x49e   : > { %v1669_v10 = vrot.slane %v827_v9, %v2895_v47  ;;  %v1791_v47 = vadd.s32 4294967272, %v2891_v45 }
 0x4a0   : > { %v1683_v11 = vsel %vm1682_vm12, %v1669_v10, %v1681_v2  ;;  %v1794_v27 = vsub.s32 %v1791_v47, %v2725_v1 }
 0x4a1   : > { %v1833_v18 = vsel %vm1832_vm13, %v1683_v11, %v1732_v63  ;;  %1606 = vadd.xlane.f32.xlu1 %v1605_v21 }
 0x4aa   : > { %1609 = vrot.lane.b32.xlu0 %v2802_v42, %s2503_s10  ;;  %s2371_s10 = scalar_lea.vmem %s1876_s0, 128 }
 0x4ab   : > { %p2372_p4 = scmp.ne.s32.totalorder %s1876_s0, %s2371_s10  ;;  %p2379_p10 = scmp.lt.s32.totalorder %s2377_s17, %s2371_s10 }
 0x4ad   : > { %p2373_p5 = pnand %p2372_p4, %p2608_p8  ;;  %p2380_p11 = por %p2379_p10, %p2378_p7 }
 0x4af   : > { %p2374_p6 = pneg %p2373_p5 }
 0x4b1   : > { %p2381_p12 = pnand %p2380_p11, %p2374_p6 }
 0x50a   : > { %v1326_v15 = vpop.xlane.xlu1 %1325 }
 0x50b   : > { %v1746_v30 = vrot.slane %v1326_v15, %v1745_v26 }
 0x50c   : > { %v1329_v16 = vpop.xlane.xlu0 %1328 }
 0x50d   : > { %v1750_v5 = vrot.slane %v1329_v16, %v1745_v26 }
 0x50e   : > { %v1586_v19 = vpop.xlane.xlu1 %1585 }
 0x50f   : > { %v1795_v31 = vrot.slane %v1586_v19, %v1794_v27  ;;  %v1775_v17 = vsel %vm1670_vm6, %v1750_v5, %v1746_v30 }
 0x511   : > { %v1592_v25 = vpop.xlane.xlu0 %1591 }
 0x512   : > { %v1332_v12 = vpop.xlane.xlu1 %1331  ;;  %v1803_v35 = vrot.slane %v1592_v25, %v1794_v27 }
 0x513   : > { %v1754_v8 = vrot.slane %v1332_v12, %v1745_v26 }
 0x515   : > { %v1598_v22 = vpop.xlane.xlu0 %1597  ;;  %v1776_v45 = vsel %vm1672_vm7, %v1754_v8, %v1775_v17 }
 0x516   : > { %v1589_v33 = vpop.xlane.xlu1 %1588  ;;  %v1811_v53 = vrot.slane %v1598_v22, %v1794_v27 }
 0x517   : > { %v1799_v42 = vrot.slane %v1589_v33, %v1794_v27 }
 0x519   : > { %v1595_v4 = vpop.xlane.xlu0 %1594  ;;  %v1824_v34 = vsel %vm1670_vm6, %v1799_v42, %v1795_v31 }
 0x51a   : > { %v1338_v20 = vpop.xlane.xlu1 %1337  ;;  %v1807_v38 = vrot.slane %v1595_v4, %v1794_v27  ;;  %v1825_v52 = vsel %vm1672_vm7, %v1803_v35, %v1824_v34 }
 0x51b   : > { %v1762_v40 = vrot.slane %v1338_v20, %v1745_v26 }
 0x51c   : > { %v1826_v49 = vsel %vm1674_vm8, %v1807_v38, %v1825_v52 }
 0x51d   : > { %v1601_v7 = vpop.xlane.xlu0 %1600  ;;  %v1827_v59 = vsel %vm1676_vm9, %v1811_v53, %v1826_v49 }
 0x51e   : > { %v1335_v23 = vpop.xlane.xlu1 %1334  ;;  %v1815_v50 = vrot.slane %v1601_v7, %v1794_v27 }
 0x51f   : > { %v1758_v32 = vrot.slane %v1335_v23, %v1745_v26 }
 0x520   : > { %v1828_v62 = vsel %vm1678_vm10, %v1815_v50, %v1827_v59 }
 0x521   : > { %v1777_v39 = vsel %vm1674_vm8, %v1758_v32, %v1776_v45  ;;  %v1604_v44 = vpop.xlane.xlu0 %1603 }
 0x522   : > { %v1341_v28 = vpop.xlane.xlu1 %1340  ;;  %v1778_v46 = vsel %vm1676_vm9, %v1762_v40, %v1777_v39  ;;  %v1819_v54 = vrot.slane %v1604_v44, %v1794_v27 }
 0x523   : > { %v1766_v1 = vrot.slane %v1341_v28, %v1745_v26 }
 0x524   : > { %v1829_v58 = vsel %vm1680_vm11, %v1819_v54, %v1828_v62 }
 0x525   : > { %v1779_v51 = vsel %vm1678_vm10, %v1766_v1, %v1778_v46 }
 0x526   : > { %v1344_v36 = vpop.xlane.xlu1 %1343 }
 0x527   : > { %v1770_v43 = vrot.slane %v1344_v36, %v1745_v26 }
 0x529   : > { %v1780_v14 = vsel %vm1680_vm11, %v1770_v43, %v1779_v51 }
 0x52a   : > { %v1347_v48 = vpop.xlane.xlu1 %1346 }
 0x52b   : > { %v1774_v24 = vrot.slane %v1347_v48, %v1745_v26 }
 0x52d   : > { %v1781_v56 = vsel %vm1682_vm12, %v1774_v24, %v1780_v14 }
 0x52e   : > { %v1834_v57 = vsel %vm619_vm3, %v1833_v18, %v1781_v56  ;;  %v1607_v60 = vpop.xlane.xlu1 %1606 }
 0x52f   : > { %v1823_v63 = vrot.slane %v1607_v60, %v1794_v27 }
 0x531   : > { %v1830_v0 = vsel %vm1682_vm12, %v1823_v63, %v1829_v58 }
 0x532   : > { %v1836_v29 = vsel %vm1835_vm14, %v1834_v57, %v1830_v0 }
 0x533   : > { %1838 = vst.msk [vmem:[%s516_s23] sm:$0xff] %vm1837_vm15, %v1836_v29 }
 0x534   : > { %2384 = shalt.err (!%p2381_p12)
}
 0x535   : > { %s2385_s23 = scalar_lea.hbm %s3042_s22, 128  ;;  %s2389_s28 = scalar_lea.hbm %s3131_s7, 512 }
 0x536   : > { %p2386_p13 = scmp.ne.s32.totalorder %s3042_s22, %s2385_s23  ;;  %p2390_p2 = scmp.lt.u32.totalorder %s3042_s22, %s3131_s7 }
 0x537   : > { %p2391_p3 = scmp.lt.u32.totalorder %s2389_s28, %s2385_s23  ;;  %p2393_p5 = scmp.lt.u32.totalorder %s2385_s23, %s3042_s22 }
 0x538   : > { %p2387_p0 = pnand %p2386_p13, %p2608_p8 }
 0x539   : > { %p2392_p4 = por %p2391_p3, %p2390_p2 }
 0x53a   : > { %p2388_p1 = pneg %p2387_p0 }
 0x53b   : > { %p2394_p6 = por %p2393_p5, %p2392_p4 }
 0x53d   : > { %p2395_p7 = pnand %p2394_p6, %p2388_p1 }
 0x53f   : > { %2398 = shalt.err (!%p2395_p7)
}
 0x540   : > { %2256 = dma.vmem_to_hbm [thread:$0]  (%p2608_p8), %s1876_s0, 128, %s3042_s22, %s1845_s18   ;;  %vm1620_vm0 = vcmask 162816   ;;  %v1610_v11 = vpop.permute.xlu0 %1609  ;;  %vm1622_vm1 = vcmask 326656   ;;  %vm1624_vm2 = vcmask 490496   ;;  %vm1626_vm3 = vcmask 654336  }
 0x541   : > { %s2505_s10 = smov 40   ;;  %s2506_s12 = smov 60   ;;  %v1621_v18 = vsel %vm1620_vm0, %v2799_v37, %v1610_v11 }
 0x542   : > { %s509_s22 = scalar_lea.vmem [#allocation4], %s2082_s13  ;;  %s3142_s18 = sshll.u32 %s3034_s21, 7 }
 0x543   : > { %s1860_s0 = sshll.u32 %s509_s22, 4  ;;  %s3070_s14 = scalar_lea.hbm %s3130_s6, %s3142_s18  ;;  %s3072_s0 = int_to_ptr.vmem [resolvable:$true] %s1860_s0 }
 0x544   : > { %s1840_s13 = scalar_lea.sflag [#allocation5], %s2653_s19  ;;  %s2399_s9 = scalar_lea.vmem %s3072_s0, 128 }
 0x545   : > { %p2400_p10 = scmp.ne.s32.totalorder %s3072_s0, %s2399_s9  ;;  %s2507_s28 = smov [#allocation4]  }
 0x546   : > { %s2403_s21 = sshll.u32 %s2507_s28, 4  ;;  %s2404_s21 = int_to_ptr.vmem [resolvable:$false] %s2403_s21 }
 0x547   : > { %p2401_p11 = pnand %p2400_p10, %p2608_p8  ;;  %s2405_s27 = scalar_lea.vmem %s2404_s21, 256 }
 0x548   : > { %p2406_p13 = scmp.lt.s32.totalorder %s3072_s0, %s2404_s21  ;;  %p2407_p0 = scmp.lt.s32.totalorder %s2405_s27, %s2399_s9 }
 0x549   : > { %v1220_v13 = vpop.f32.mrb[12].mxu1  ;;  %p2402_p12 = pneg %p2401_p11 }
 0x54a   : > { %1613 = vrot.lane.b32.xlu1 %v1220_v13, %s2505_s10  ;;  %v2236_v61 = vpop.f32.mrb[13].mxu1  ;;  %p2408_p1 = por %p2407_p0, %p2406_p13 }
 0x54b   : > { %v1223_v41 = vpop.f32.mrb[14].mxu1 }
 0x54c   : > { %v2237_v2 = vpop.f32.mrb[15].mxu1  ;;  %p2409_p2 = pnand %p2408_p1, %p2402_p12 }
 0x54d   : > { %v1480_v3 = vpop.f32.mrb[12].mxu0 }
 0x54e   : > { %v2252_v6 = vpop.f32.mrb[13].mxu0  ;;  %1617 = vrot.lane.b32.xlu1 %v1480_v3, %s2506_s12 }
 0x54f   : > { %v1483_v9 = vpop.f32.mrb[14].mxu0 }
 0x550   : > { %v2253_v10 = vpop.f32.mrb[15].mxu0 }
 0x5bc   : > { %v1614_v21 = vpop.permute.xlu1 %1613 }
 0x5bd   : > { %v1623_v15 = vsel %vm1622_vm1, %v1621_v18, %v1614_v21 }
 0x5c0   : > { %v1618_v16 = vpop.permute.xlu1 %1617 }
 0x5c1   : > { %v1625_v19 = vsel %vm1624_vm2, %v1623_v15, %v1618_v16 }
 0x5c2   : > { %1627 = vst.msk [vmem:[%s509_s22] sm:$0xff] %vm1626_vm3, %v1625_v19 }
 0x5c3   : > { %2412 = shalt.err (!%p2409_p2)
}
 0x5c4   : > { %s2413_s19 = scalar_lea.hbm %s3070_s14, 128  ;;  %s2417_s22 = scalar_lea.hbm %s3130_s6, 512 }
 0x5c5   : > { %p2414_p3 = scmp.ne.s32.totalorder %s3070_s14, %s2413_s19  ;;  %p2418_p6 = scmp.lt.u32.totalorder %s3070_s14, %s3130_s6 }
 0x5c6   : > { %p2419_p7 = scmp.lt.u32.totalorder %s2417_s22, %s2413_s19  ;;  %p2421_p11 = scmp.lt.u32.totalorder %s2413_s19, %s3070_s14 }
 0x5c7   : > { %p2415_p4 = pnand %p2414_p3, %p2608_p8 }
 0x5c8   : > { %p2420_p10 = por %p2419_p7, %p2418_p6 }
 0x5c9   : > { %p2416_p5 = pneg %p2415_p4 }
 0x5ca   : > { %p2422_p12 = por %p2421_p11, %p2420_p10 }
 0x5cc   : > { %p2423_p13 = pnand %p2422_p12, %p2416_p5 }
 0x5ce   : > { %2426 = shalt.err (!%p2423_p13)
}
 0x5cf   : > { %2255 = dma.vmem_to_hbm [thread:$0]  (%p2608_p8), %s3072_s0, 128, %s3070_s14, %s1840_s13  }
 0x5d0 PF: > { %p2266_p0 = scmp.ge.s32.totalorder %s2497_s8, 2  ;;  %s1887_s23 = sand.u32 1, %s2469_s24  }
 0x5d1   : > { %s1888_s9 = scalar_lea.sflag [#allocation5], %s1887_s23 }
 0x5d2   : > { %p2260_p1 = pnand %p2266_p0, %p2612_p9 }
 0x5d4   : > { %2460 = dma.done.wait (!%p2260_p1), %s1888_s9, 128  }
 0x5d5   : > { %2462 = vsyncadd (!%p2260_p1), %s1888_s9, 4294967168  ;;  %s1897_s28 = scalar_lea.sflag [#allocation7], %s1887_s23 }
 0x5d6   : > { %2464 = dma.done.wait (!%p2260_p1), %s1897_s28, 128  }
 0x5d7   : > { %2466 = vsyncadd (!%p2260_p1), %s1897_s28, 4294967168  ;;  %s24_s8 = sadd.s32 1, %s2497_s8   ;;  %s3143_s15 = sld [smem:[#allocation10_spill]] }
 0x5d8   : > { %p21_p2 = scmp.ge.s32.totalorder %s24_s8, 6   ;;  %s3144_s24 = smov %s2473_s25 }
 0x5d9   : > { %s3145_s25 = smov %s2477_s26  ;;  %s3146_s26 = smov %s2620_s20 }
 0x5da   : > { %s3147_s27 = smov %s2489_s29  ;;  %s3148_s28 = smov %s2493_s30 }
 0x5db   : > { %s3149_s29 = smov %s3152_s11  ;;  %23 = sbr.rel (!%p21_p2) target bundleno = 9 (0x9), region = 215 }
 0x5dd   : > { %s3150_s30 = smov %s3143_s15 }
 0x5e2   :  { %1902 = vsyncpa [#allocation5], 1 }
 0x5e3   :  { %1904 = vsyncpa [#allocation5 + $0x1], 1 }
 0x5e4   :  { %1905 = vsyncpa [#allocation7], 1 }
 0x5e5   :  { %1907 = vsyncpa [#allocation7 + $0x1], 1 }

</bundles_post_ra>
